<compile_context>
chip_gen: v7x
topology: tpu7x:2x2x1
jax: 0.10.0
libtpu: 0.0.40
codegen_flags: <defaults>
</compile_context>

<pallas_src>
import jax
import jax.numpy as jnp
import numpy as np
from jax import lax
from jax.experimental import pallas as pl
from jax.experimental.pallas import tpu as pltpu

HIDDEN = 32     # hidden_size
OUTPUT = 64     # output_size (decoder vocab)
INPUT = 64      # input_size  (encoder vocab)
VPAD = 128      # lane-dense padded vocab width for logits / log-softmax


# ----------------------------------------------------------------------------
# Shared GRU cell math (PyTorch nn.GRU gate order [r, z, n])
# ----------------------------------------------------------------------------
def _gru_step(gi, h, w_h, b):
    """gi: (1,3H) precomputed input projection; h: (1,H); w_h: (H,3H); b: (1,4H)."""
    H = HIDDEN
    gh = jnp.dot(h, w_h, preferred_element_type=jnp.float32)           # (1, 3H)
    # merged r/z: one 64-lane add chain + one sigmoid, then lane-slice
    grz = jax.nn.sigmoid(gi[:, :2 * H] + gh[:, :2 * H] + b[:, :2 * H])
    r = grz[:, :H]
    z = grz[:, H:2 * H]
    n = jnp.tanh(gi[:, 2 * H:3 * H] + b[:, 2 * H:3 * H]
                 + r * (gh[:, 2 * H:3 * H] + b[:, 3 * H:4 * H]))
    return (1.0 - z) * n + z * h


# ----------------------------------------------------------------------------
# Kernels (one invocation per sequence; grid=(1,))
# ----------------------------------------------------------------------------
def _decoder_seq_kernel(tok_ref,                       # SMEM (T,) int32 (scalar prefetch)
                        emb_ref,                       # (OUTPUT, H) embedding table
                        h0_ref,                        # (1, H) initial hidden
                        w_i_ref, w_h_ref,              # (H, 3H) fused gate weights [r|z|n]
                        b_ref,                         # (1, 4H) packed biases [br|bz|bin|bhn]
                        w_out_ref, b_out_ref,          # (H, VPAD), (1, VPAD) padded projection
                        logp_ref,                      # out: (T, VPAD) log-softmax (resident)
                        hout_ref,                      # out: (1, H) final hidden
                        x_ref,                         # scratch: (T, H) gathered embeddings
                        gi_ref):                       # scratch: (T, 3H) input projections
    f32 = jnp.float32
    T = x_ref.shape[0]

    # Phase 1: gather + ReLU all T embedding rows.
    def gather(t, c):
        tok = tok_ref[t]
        x_ref[pl.ds(t, 1), :] = jnp.maximum(emb_ref[pl.ds(tok, 1), :], 0.0)
        return c
    lax.fori_loop(0, T, gather, 0, unroll=True)

    # Phase 2: one (T,H)x(H,3H) matmul for every step's input-gate projection.
    gi_ref[...] = jnp.dot(x_ref[...], w_i_ref[...], preferred_element_type=f32)

    # Hoist loop-invariant weights out of the recurrence.
    w_h = w_h_ref[...]
    b = b_ref[...]
    w_out = w_out_ref[...]
    b_out = b_out_ref[...]

    # Phase 3: serial GRU recurrence + per-step lane-dense log-softmax.
    def step(t, h):
        gi = gi_ref[pl.ds(t, 1), :]                                     # (1, 3H)
        h_new = _gru_step(gi, h, w_h, b)
        logits = jnp.dot(h_new, w_out, preferred_element_type=f32) + b_out   # (1, VPAD)
        m = jnp.max(logits, axis=1, keepdims=True)
        shifted = logits - m
        lse = jnp.log(jnp.sum(jnp.exp(shifted), axis=1, keepdims=True))
        logp_ref[pl.ds(t, 1), :] = shifted - lse
        return h_new

    h_final = lax.fori_loop(0, T, step, h0_ref[...], unroll=True)
    hout_ref[...] = h_final


def _encoder_seq_kernel(tok_ref,                       # SMEM (T,) int32 (scalar prefetch)
                        emb_ref,                       # (INPUT, H)
                        h0_ref,                        # (1, H)
                        w_i_ref, w_h_ref,              # (H, 3H)
                        b_ref,                         # (1, 4H)
                        outs_ref,                      # out: (T, H) GRU outputs (resident)
                        hout_ref,                      # out: (1, H) final hidden
                        x_ref,                         # scratch: (T, H)
                        gi_ref):                       # scratch: (T, 3H)
    f32 = jnp.float32
    T = x_ref.shape[0]

    # Phase 1: gather all T embedding rows (no ReLU in encoder).
    def gather(t, c):
        tok = tok_ref[t]
        x_ref[pl.ds(t, 1), :] = emb_ref[pl.ds(tok, 1), :]
        return c
    lax.fori_loop(0, T, gather, 0, unroll=True)

    # Phase 2: batched input-gate projection.
    gi_ref[...] = jnp.dot(x_ref[...], w_i_ref[...], preferred_element_type=f32)

    w_h = w_h_ref[...]
    b = b_ref[...]

    # Phase 3: serial GRU recurrence; per-step output written into resident block.
    def step(t, h):
        gi = gi_ref[pl.ds(t, 1), :]
        h_new = _gru_step(gi, h, w_h, b)
        outs_ref[pl.ds(t, 1), :] = h_new
        return h_new

    h_final = lax.fori_loop(0, T, step, h0_ref[...], unroll=True)
    hout_ref[...] = h_final


# ----------------------------------------------------------------------------
# Wrappers
# ----------------------------------------------------------------------------
def decoder_rnn_forward_seq(tokens, hidden, params):
    """Run T teacher-forced DecoderRNN steps in one pallas_call.

    tokens: (T,) int32, hidden: (1,1,H) f32
    returns (log_probs (T, OUTPUT), new_hidden (1,1,H))
    """
    T = int(tokens.shape[0])
    h0 = hidden.reshape(1, HIDDEN).astype(jnp.float32)
    const = lambda i, tok: (0, 0)

    grid_spec = pltpu.PrefetchScalarGridSpec(
        num_scalar_prefetch=1,
        grid=(1,),
        in_specs=[
            pl.BlockSpec((OUTPUT, HIDDEN), const),           # embedding
            pl.BlockSpec((1, HIDDEN), const),                # h0
            pl.BlockSpec((HIDDEN, 3 * HIDDEN), const),       # W_i
            pl.BlockSpec((HIDDEN, 3 * HIDDEN), const),       # W_h
            pl.BlockSpec((1, 4 * HIDDEN), const),            # packed biases
            pl.BlockSpec((HIDDEN, VPAD), const),             # W_out (padded)
            pl.BlockSpec((1, VPAD), const),                  # b_out (padded)
        ],
        out_specs=(
            pl.BlockSpec((T, VPAD), const),                  # all-step log-probs (resident)
            pl.BlockSpec((1, HIDDEN), const),                # final hidden
        ),
        scratch_shapes=[
            pltpu.VMEM((T, HIDDEN), jnp.float32),            # gathered embeddings
            pltpu.VMEM((T, 3 * HIDDEN), jnp.float32),        # precomputed gi
        ],
    )

    logp_pad, h_final = pl.pallas_call(
        _decoder_seq_kernel,
        grid_spec=grid_spec,
        out_shape=(
            jax.ShapeDtypeStruct((T, VPAD), jnp.float32),
            jax.ShapeDtypeStruct((1, HIDDEN), jnp.float32),
        ),
        compiler_params=pltpu.CompilerParams(dimension_semantics=("arbitrary",)),
    )(
        tokens.astype(jnp.int32),
        params["embedding"], h0,
        params["w_i"], params["w_h"], params["b"],
        params["w_out_pad"], params["b_out_pad"],
    )
    return logp_pad[:, :OUTPUT], h_final.reshape(1, 1, HIDDEN)


def decoder_rnn_forward(token_id, hidden, params):
    """Single-step DecoderRNN.forward(input, hidden) -> (logp (1,OUTPUT), hidden (1,1,H))."""
    # TODO(synk): for autoregressive generation, move the full greedy-decode loop
    # (in-kernel argmax over the 128-lane logits feeding the next gather) inside
    # one kernel instead of one pallas_call per generated token.
    logp, h_new = decoder_rnn_forward_seq(token_id.reshape(1), hidden, params)
    return logp, h_new


def encoder_rnn_forward_seq(tokens, hidden, params):
    """Run the EncoderRNN over a token sequence in one pallas_call.

    returns (outputs (T,1,H), hidden (1,1,H))
    """
    T = int(tokens.shape[0])
    h0 = hidden.reshape(1, HIDDEN).astype(jnp.float32)
    const = lambda i, tok: (0, 0)

    grid_spec = pltpu.PrefetchScalarGridSpec(
        num_scalar_prefetch=1,
        grid=(1,),
        in_specs=[
            pl.BlockSpec((INPUT, HIDDEN), const),
            pl.BlockSpec((1, HIDDEN), const),
            pl.BlockSpec((HIDDEN, 3 * HIDDEN), const),
            pl.BlockSpec((HIDDEN, 3 * HIDDEN), const),
            pl.BlockSpec((1, 4 * HIDDEN), const),
        ],
        out_specs=(
            pl.BlockSpec((T, HIDDEN), const),                # all-step outputs (resident)
            pl.BlockSpec((1, HIDDEN), const),                # final hidden
        ),
        scratch_shapes=[
            pltpu.VMEM((T, HIDDEN), jnp.float32),
            pltpu.VMEM((T, 3 * HIDDEN), jnp.float32),
        ],
    )

    outs, h_final = pl.pallas_call(
        _encoder_seq_kernel,
        grid_spec=grid_spec,
        out_shape=(
            jax.ShapeDtypeStruct((T, HIDDEN), jnp.float32),
            jax.ShapeDtypeStruct((1, HIDDEN), jnp.float32),
        ),
        compiler_params=pltpu.CompilerParams(dimension_semantics=("arbitrary",)),
    )(
        tokens.astype(jnp.int32),
        params["embedding"], h0,
        params["w_i"], params["w_h"], params["b"],
    )
    return outs.reshape(T, 1, HIDDEN), h_final.reshape(1, 1, HIDDEN)


def seq2seq_forward(post, enc_params):
    """Mirrors Seq2Seq.forward: runs the encoder over `post`.

    The PyTorch body ends with `pass`, so the encoder hidden state (encoder_rep)
    is the only quantity computed; we return it so it can be used/checked.
    """
    init_hidden = jnp.zeros((1, 1, HIDDEN), jnp.float32)   # encoder.initHidden()
    _, encoder_rep = encoder_rnn_forward_seq(post, init_hidden, enc_params)
    return encoder_rep


# ----------------------------------------------------------------------------
# Parameters (deterministic synthetic, PyTorch layouts packed for the kernel)
# ----------------------------------------------------------------------------
def _pack_gru(w_ih, w_hh, b_ih, b_hh):
    H = HIDDEN
    w_i = w_ih.T                                # (H, 3H), gate order [r, z, n]
    w_h = w_hh.T                                # (H, 3H)
    b = jnp.concatenate([
        b_ih[0:H] + b_hh[0:H],                  # r : b_ir + b_hr
        b_ih[H:2 * H] + b_hh[H:2 * H],          # z : b_iz + b_hz
        b_ih[2 * H:3 * H],                      # n : b_in
        b_hh[2 * H:3 * H],                      # n : b_hn (stays inside r*(...))
    ])[None, :]                                 # (1, 4H) == (1, 128)
    return w_i, w_h, b


def make_encoder_params(key):
    ks = jax.random.split(key, 5)
    s = 0.1
    emb = jax.random.normal(ks[0], (INPUT, HIDDEN), jnp.float32) * s
    w_ih = jax.random.normal(ks[1], (3 * HIDDEN, HIDDEN), jnp.float32) * s
    w_hh = jax.random.normal(ks[2], (3 * HIDDEN, HIDDEN), jnp.float32) * s
    b_ih = jax.random.normal(ks[3], (3 * HIDDEN,), jnp.float32) * s
    b_hh = jax.random.normal(ks[4], (3 * HIDDEN,), jnp.float32) * s
    w_i, w_h, b = _pack_gru(w_ih, w_hh, b_ih, b_hh)
    return {
        "embedding": emb, "w_i": w_i, "w_h": w_h, "b": b,
        "raw": {"embedding": emb, "w_ih": w_ih, "w_hh": w_hh, "b_ih": b_ih, "b_hh": b_hh},
    }


def make_decoder_params(key):
    ks = jax.random.split(key, 7)
    s = 0.1
    emb = jax.random.normal(ks[0], (OUTPUT, HIDDEN), jnp.float32) * s
    w_ih = jax.random.normal(ks[1], (3 * HIDDEN, HIDDEN), jnp.float32) * s
    w_hh = jax.random.normal(ks[2], (3 * HIDDEN, HIDDEN), jnp.float32) * s
    b_ih = jax.random.normal(ks[3], (3 * HIDDEN,), jnp.float32) * s
    b_hh = jax.random.normal(ks[4], (3 * HIDDEN,), jnp.float32) * s
    w_out = jax.random.normal(ks[5], (OUTPUT, HIDDEN), jnp.float32) * s
    b_out = jax.random.normal(ks[6], (OUTPUT,), jnp.float32) * s
    w_i, w_h, b = _pack_gru(w_ih, w_hh, b_ih, b_hh)
    # lane-dense padded output projection: zeros in padded weight cols, -1e30 bias
    # in padded vocab slots so exp() underflows to exactly 0 in the log-sum-exp.
    w_out_pad = jnp.zeros((HIDDEN, VPAD), jnp.float32).at[:, :OUTPUT].set(w_out.T)
    b_out_pad = jnp.full((VPAD,), -1e30, jnp.float32).at[:OUTPUT].set(b_out)[None, :]
    return {
        "embedding": emb, "w_i": w_i, "w_h": w_h, "b": b,
        "w_out_pad": w_out_pad, "b_out_pad": b_out_pad,
        "raw": {"embedding": emb, "w_ih": w_ih, "w_hh": w_hh, "b_ih": b_ih,
                "b_hh": b_hh, "w_out": w_out, "b_out": b_out},
    }


# ----------------------------------------------------------------------------
# Pure-JAX references (mirror PyTorch nn.GRU / nn.Linear semantics)
# ----------------------------------------------------------------------------
def _gru_cell_ref(x, h, raw):
    H = HIDDEN
    hi = jax.lax.Precision.HIGHEST
    gi = jnp.dot(x, raw["w_ih"].T, precision=hi) + raw["b_ih"][None, :]
    gh = jnp.dot(h, raw["w_hh"].T, precision=hi) + raw["b_hh"][None, :]
    r = jax.nn.sigmoid(gi[:, :H] + gh[:, :H])
    z = jax.nn.sigmoid(gi[:, H:2 * H] + gh[:, H:2 * H])
    n = jnp.tanh(gi[:, 2 * H:] + r * gh[:, 2 * H:])
    return (1.0 - z) * n + z * h


def reference_encoder_seq(tokens, hidden, raw):
    h = hidden.reshape(1, HIDDEN)
    outs = []
    for t in range(tokens.shape[0]):
        x = raw["embedding"][tokens[t]][None, :]
        h = _gru_cell_ref(x, h, raw)
        outs.append(h)
    return jnp.stack(outs, axis=0), h.reshape(1, 1, HIDDEN)


def reference_decoder_seq(tokens, hidden, raw):
    h = hidden.reshape(1, HIDDEN)
    hi = jax.lax.Precision.HIGHEST
    logps = []
    for t in range(tokens.shape[0]):
        x = jnp.maximum(raw["embedding"][tokens[t]][None, :], 0.0)
        h = _gru_cell_ref(x, h, raw)
        logits = jnp.dot(h, raw["w_out"].T, precision=hi) + raw["b_out"][None, :]
        logps.append(jax.nn.log_softmax(logits, axis=1))
    return jnp.concatenate(logps, axis=0), h.reshape(1, 1, HIDDEN)


# ----------------------------------------------------------------------------
if __name__ == "__main__":
    key = jax.random.PRNGKey(0)
    k_enc, k_dec, k_post, k_tgt = jax.random.split(key, 4)
    enc_params = make_encoder_params(k_enc)
    dec_params = make_decoder_params(k_dec)

    T = 8
    post = jax.random.randint(k_post, (T,), 0, INPUT, dtype=jnp.int32)    # encoder tokens
    tgt = jax.random.randint(k_tgt, (T,), 0, OUTPUT, dtype=jnp.int32)     # decoder tokens

    # --- Seq2Seq.forward: encoder over `post` ---
    init_hidden = jnp.zeros((1, 1, HIDDEN), jnp.float32)
    enc_outs, encoder_rep = encoder_rnn_forward_seq(post, init_hidden, enc_params)
    ref_enc_outs, ref_encoder_rep = reference_encoder_seq(post, init_hidden, enc_params["raw"])

    # --- Decoder: fused multi-step kernel (teacher-forced tokens) ---
    logp_seq, h_final = decoder_rnn_forward_seq(tgt, encoder_rep, dec_params)
    ref_logp_seq, ref_h_final = reference_decoder_seq(tgt, ref_encoder_rep, dec_params["raw"])

    # --- Decoder: single-step DecoderRNN.forward(input, hidden) ---
    logp1, h1 = decoder_rnn_forward(tgt[:1], encoder_rep, dec_params)
    ref_logp1, ref_h1 = reference_decoder_seq(tgt[:1], ref_encoder_rep, dec_params["raw"])

    jax.block_until_ready((enc_outs, encoder_rep, logp_seq, h_final, logp1, h1))

    def _check(a, b):
        np.testing.assert_allclose(np.asarray(a), np.asarray(b), atol=1e-4, rtol=1e-4)

    _check(enc_outs, ref_enc_outs)
    _check(encoder_rep, ref_encoder_rep)
    _check(logp_seq, ref_logp_seq)
    _check(h_final, ref_h_final)
    _check(logp1, ref_logp1)
    _check(h1, ref_h1)
    assert enc_outs.shape == (T, 1, HIDDEN) and encoder_rep.shape == (1, 1, HIDDEN)
    assert logp_seq.shape == (T, OUTPUT) and h_final.shape == (1, 1, HIDDEN)
    assert logp1.shape == (1, OUTPUT) and h1.shape == (1, 1, HIDDEN)

    print("KERNEL_OK")
</pallas_src>

<mosaic_0001>
module attributes {stable_mosaic.version = 11 : i64} {
  func.func @_encoder_seq_kernel(%arg0: i32, %arg1: memref<8xi32, #tpu.memory_space<smem>>, %arg2: memref<64x32xf32, #tpu.memory_space<vmem>>, %arg3: memref<1x32xf32, #tpu.memory_space<vmem>>, %arg4: memref<32x96xf32, #tpu.memory_space<vmem>>, %arg5: memref<32x96xf32, #tpu.memory_space<vmem>>, %arg6: memref<1x128xf32, #tpu.memory_space<vmem>>, %arg7: memref<8x32xf32, #tpu.memory_space<vmem>>, %arg8: memref<1x32xf32, #tpu.memory_space<vmem>>, %arg9: memref<8x32xf32, #tpu.memory_space<vmem>>, %arg10: memref<8x96xf32, #tpu.memory_space<vmem>>) attributes {dimension_semantics = [#tpu.dimension_semantics<arbitrary>], iteration_bounds = array<i64: 1>, scalar_prefetch = 1 : i64, scratch_operands = 2 : i64, tpu.core_type = #tpu.core_type<tc>, window_params = [{pipeline_mode = #tpu.pipeline_mode<synchronous>, transform_indices = @transform_0, window_bounds = array<i64: 64, 32>}, {pipeline_mode = #tpu.pipeline_mode<synchronous>, transform_indices = @transform_1, window_bounds = array<i64: 1, 32>}, {pipeline_mode = #tpu.pipeline_mode<synchronous>, transform_indices = @transform_2, window_bounds = array<i64: 32, 96>}, {pipeline_mode = #tpu.pipeline_mode<synchronous>, transform_indices = @transform_3, window_bounds = array<i64: 32, 96>}, {pipeline_mode = #tpu.pipeline_mode<synchronous>, transform_indices = @transform_4, window_bounds = array<i64: 1, 128>}, {pipeline_mode = #tpu.pipeline_mode<synchronous>, transform_indices = @transform_5, window_bounds = array<i64: 8, 32>}, {pipeline_mode = #tpu.pipeline_mode<synchronous>, transform_indices = @transform_6, window_bounds = array<i64: 1, 32>}]} {
    %c0_i32 = arith.constant 0 : i32
    %0 = arith.index_cast %c0_i32 : i32 to index
    %1 = memref.load %arg1[%0] : memref<8xi32, #tpu.memory_space<smem>>
    %2 = arith.index_cast %1 : i32 to index
    %c0 = arith.constant 0 : index
    %3 = vector.load %arg2[%2, %c0] : memref<64x32xf32, #tpu.memory_space<vmem>>, vector<1x32xf32>
    %4 = arith.index_cast %c0_i32 : i32 to index
    %c0_0 = arith.constant 0 : index
    %5 = vector.load %arg9[%4, %c0_0] : memref<8x32xf32, #tpu.memory_space<vmem>>, vector<1x32xf32>
    tpu.vector_store %arg9[%4, %c0_0], %3 {strides = array<i32>} : memref<8x32xf32, #tpu.memory_space<vmem>>, vector<1x32xf32>,
    %c1_i32 = arith.constant 1 : i32
    %6 = arith.index_cast %c1_i32 : i32 to index
    %7 = memref.load %arg1[%6] : memref<8xi32, #tpu.memory_space<smem>>
    %8 = arith.index_cast %7 : i32 to index
    %c0_1 = arith.constant 0 : index
    %9 = vector.load %arg2[%8, %c0_1] : memref<64x32xf32, #tpu.memory_space<vmem>>, vector<1x32xf32>
    %10 = arith.index_cast %c1_i32 : i32 to index
    %c0_2 = arith.constant 0 : index
    %11 = vector.load %arg9[%10, %c0_2] : memref<8x32xf32, #tpu.memory_space<vmem>>, vector<1x32xf32>
    tpu.vector_store %arg9[%10, %c0_2], %9 {strides = array<i32>} : memref<8x32xf32, #tpu.memory_space<vmem>>, vector<1x32xf32>,
    %c2_i32 = arith.constant 2 : i32
    %12 = arith.index_cast %c2_i32 : i32 to index
    %13 = memref.load %arg1[%12] : memref<8xi32, #tpu.memory_space<smem>>
    %14 = arith.index_cast %13 : i32 to index
    %c0_3 = arith.constant 0 : index
    %15 = vector.load %arg2[%14, %c0_3] : memref<64x32xf32, #tpu.memory_space<vmem>>, vector<1x32xf32>
    %16 = arith.index_cast %c2_i32 : i32 to index
    %c0_4 = arith.constant 0 : index
    %17 = vector.load %arg9[%16, %c0_4] : memref<8x32xf32, #tpu.memory_space<vmem>>, vector<1x32xf32>
    tpu.vector_store %arg9[%16, %c0_4], %15 {strides = array<i32>} : memref<8x32xf32, #tpu.memory_space<vmem>>, vector<1x32xf32>,
    %c3_i32 = arith.constant 3 : i32
    %18 = arith.index_cast %c3_i32 : i32 to index
    %19 = memref.load %arg1[%18] : memref<8xi32, #tpu.memory_space<smem>>
    %20 = arith.index_cast %19 : i32 to index
    %c0_5 = arith.constant 0 : index
    %21 = vector.load %arg2[%20, %c0_5] : memref<64x32xf32, #tpu.memory_space<vmem>>, vector<1x32xf32>
    %22 = arith.index_cast %c3_i32 : i32 to index
    %c0_6 = arith.constant 0 : index
    %23 = vector.load %arg9[%22, %c0_6] : memref<8x32xf32, #tpu.memory_space<vmem>>, vector<1x32xf32>
    tpu.vector_store %arg9[%22, %c0_6], %21 {strides = array<i32>} : memref<8x32xf32, #tpu.memory_space<vmem>>, vector<1x32xf32>,
    %c4_i32 = arith.constant 4 : i32
    %24 = arith.index_cast %c4_i32 : i32 to index
    %25 = memref.load %arg1[%24] : memref<8xi32, #tpu.memory_space<smem>>
    %26 = arith.index_cast %25 : i32 to index
    %c0_7 = arith.constant 0 : index
    %27 = vector.load %arg2[%26, %c0_7] : memref<64x32xf32, #tpu.memory_space<vmem>>, vector<1x32xf32>
    %28 = arith.index_cast %c4_i32 : i32 to index
    %c0_8 = arith.constant 0 : index
    %29 = vector.load %arg9[%28, %c0_8] : memref<8x32xf32, #tpu.memory_space<vmem>>, vector<1x32xf32>
    tpu.vector_store %arg9[%28, %c0_8], %27 {strides = array<i32>} : memref<8x32xf32, #tpu.memory_space<vmem>>, vector<1x32xf32>,
    %c5_i32 = arith.constant 5 : i32
    %30 = arith.index_cast %c5_i32 : i32 to index
    %31 = memref.load %arg1[%30] : memref<8xi32, #tpu.memory_space<smem>>
    %32 = arith.index_cast %31 : i32 to index
    %c0_9 = arith.constant 0 : index
    %33 = vector.load %arg2[%32, %c0_9] : memref<64x32xf32, #tpu.memory_space<vmem>>, vector<1x32xf32>
    %34 = arith.index_cast %c5_i32 : i32 to index
    %c0_10 = arith.constant 0 : index
    %35 = vector.load %arg9[%34, %c0_10] : memref<8x32xf32, #tpu.memory_space<vmem>>, vector<1x32xf32>
    tpu.vector_store %arg9[%34, %c0_10], %33 {strides = array<i32>} : memref<8x32xf32, #tpu.memory_space<vmem>>, vector<1x32xf32>,
    %c6_i32 = arith.constant 6 : i32
    %36 = arith.index_cast %c6_i32 : i32 to index
    %37 = memref.load %arg1[%36] : memref<8xi32, #tpu.memory_space<smem>>
    %38 = arith.index_cast %37 : i32 to index
    %c0_11 = arith.constant 0 : index
    %39 = vector.load %arg2[%38, %c0_11] : memref<64x32xf32, #tpu.memory_space<vmem>>, vector<1x32xf32>
    %40 = arith.index_cast %c6_i32 : i32 to index
    %c0_12 = arith.constant 0 : index
    %41 = vector.load %arg9[%40, %c0_12] : memref<8x32xf32, #tpu.memory_space<vmem>>, vector<1x32xf32>
    tpu.vector_store %arg9[%40, %c0_12], %39 {strides = array<i32>} : memref<8x32xf32, #tpu.memory_space<vmem>>, vector<1x32xf32>,
    %c7_i32 = arith.constant 7 : i32
    %42 = arith.index_cast %c7_i32 : i32 to index
    %43 = memref.load %arg1[%42] : memref<8xi32, #tpu.memory_space<smem>>
    %44 = arith.index_cast %43 : i32 to index
    %c0_13 = arith.constant 0 : index
    %45 = vector.load %arg2[%44, %c0_13] : memref<64x32xf32, #tpu.memory_space<vmem>>, vector<1x32xf32>
    %46 = arith.index_cast %c7_i32 : i32 to index
    %c0_14 = arith.constant 0 : index
    %47 = vector.load %arg9[%46, %c0_14] : memref<8x32xf32, #tpu.memory_space<vmem>>, vector<1x32xf32>
    tpu.vector_store %arg9[%46, %c0_14], %45 {strides = array<i32>} : memref<8x32xf32, #tpu.memory_space<vmem>>, vector<1x32xf32>,
    %c8_i32 = arith.constant 8 : i32
    %c0_15 = arith.constant 0 : index
    %c0_16 = arith.constant 0 : index
    %48 = vector.load %arg9[%c0_15, %c0_16] : memref<8x32xf32, #tpu.memory_space<vmem>>, vector<8x32xf32>
    %c0_17 = arith.constant 0 : index
    %c0_18 = arith.constant 0 : index
    %49 = vector.load %arg4[%c0_17, %c0_18] : memref<32x96xf32, #tpu.memory_space<vmem>>, vector<32x96xf32>
    %cst = arith.constant dense<0.000000e+00> : vector<8x96xf32>
    %50 = tpu.matmul %48, %49, %cst {dimension_numbers = #tpu.dot_dimension_numbers<[1], [0], [0], [1], [0, 0, 1, 1], [], []>} : vector<8x32xf32>, vector<32x96xf32>, vector<8x96xf32> -> vector<8x96xf32>
    %c0_19 = arith.constant 0 : index
    %c0_20 = arith.constant 0 : index
    %51 = vector.load %arg10[%c0_19, %c0_20] : memref<8x96xf32, #tpu.memory_space<vmem>>, vector<8x96xf32>
    tpu.vector_store %arg10[%c0_19, %c0_20], %50 {strides = array<i32>} : memref<8x96xf32, #tpu.memory_space<vmem>>, vector<8x96xf32>,
    %c0_21 = arith.constant 0 : index
    %c0_22 = arith.constant 0 : index
    %52 = vector.load %arg5[%c0_21, %c0_22] : memref<32x96xf32, #tpu.memory_space<vmem>>, vector<32x96xf32>
    %c0_23 = arith.constant 0 : index
    %c0_24 = arith.constant 0 : index
    %53 = vector.load %arg6[%c0_23, %c0_24] : memref<1x128xf32, #tpu.memory_space<vmem>>, vector<1x128xf32>
    %c0_25 = arith.constant 0 : index
    %c0_26 = arith.constant 0 : index
    %54 = vector.load %arg3[%c0_25, %c0_26] : memref<1x32xf32, #tpu.memory_space<vmem>>, vector<1x32xf32>
    %c0_i32_27 = arith.constant 0 : i32
    %55 = arith.index_cast %c0_i32_27 : i32 to index
    %c0_28 = arith.constant 0 : index
    %56 = vector.load %arg10[%55, %c0_28] : memref<8x96xf32, #tpu.memory_space<vmem>>, vector<1x96xf32>
    %cst_29 = arith.constant dense<0.000000e+00> : vector<1x96xf32>
    %57 = tpu.matmul %54, %52, %cst_29 {dimension_numbers = #tpu.dot_dimension_numbers<[1], [0], [0], [1], [0, 0, 1, 1], [], []>} : vector<1x32xf32>, vector<32x96xf32>, vector<1x96xf32> -> vector<1x96xf32>
    %58 = vector.extract_strided_slice %56 {offsets = [0, 0], sizes = [1, 64], strides = [1, 1]} : vector<1x96xf32> to vector<1x64xf32>
    %59 = vector.extract_strided_slice %57 {offsets = [0, 0], sizes = [1, 64], strides = [1, 1]} : vector<1x96xf32> to vector<1x64xf32>
    %60 = arith.addf %58, %59 : vector<1x64xf32>
    %61 = vector.extract_strided_slice %53 {offsets = [0, 0], sizes = [1, 64], strides = [1, 1]} : vector<1x128xf32> to vector<1x64xf32>
    %62 = arith.addf %60, %61 : vector<1x64xf32>
    %63 = arith.negf %62 : vector<1x64xf32>
    %64 = math.exp %63 : vector<1x64xf32>
    %cst_30 = arith.constant 1.000000e+00 : f32
    %65 = vector.broadcast %cst_30 : f32 to vector<1x64xf32>
    %66 = arith.addf %65, %64 : vector<1x64xf32>
    %67 = arith.divf %65, %66 : vector<1x64xf32>
    %68 = vector.extract_strided_slice %67 {offsets = [0, 0], sizes = [1, 32], strides = [1, 1]} : vector<1x64xf32> to vector<1x32xf32>
    %69 = vector.extract_strided_slice %67 {offsets = [0, 32], sizes = [1, 32], strides = [1, 1]} : vector<1x64xf32> to vector<1x32xf32>
    %70 = vector.extract_strided_slice %56 {offsets = [0, 64], sizes = [1, 32], strides = [1, 1]} : vector<1x96xf32> to vector<1x32xf32>
    %71 = vector.extract_strided_slice %53 {offsets = [0, 64], sizes = [1, 32], strides = [1, 1]} : vector<1x128xf32> to vector<1x32xf32>
    %72 = arith.addf %70, %71 : vector<1x32xf32>
    %73 = vector.extract_strided_slice %57 {offsets = [0, 64], sizes = [1, 32], strides = [1, 1]} : vector<1x96xf32> to vector<1x32xf32>
    %74 = vector.extract_strided_slice %53 {offsets = [0, 96], sizes = [1, 32], strides = [1, 1]} : vector<1x128xf32> to vector<1x32xf32>
    %75 = arith.addf %73, %74 : vector<1x32xf32>
    %76 = arith.mulf %68, %75 : vector<1x32xf32>
    %77 = arith.addf %72, %76 : vector<1x32xf32>
    %78 = math.tanh %77 : vector<1x32xf32>
    %cst_31 = arith.constant 1.000000e+00 : f32
    %79 = vector.broadcast %cst_31 : f32 to vector<1x32xf32>
    %80 = arith.subf %79, %69 : vector<1x32xf32>
    %81 = arith.mulf %80, %78 : vector<1x32xf32>
    %82 = arith.mulf %69, %54 : vector<1x32xf32>
    %83 = arith.addf %81, %82 : vector<1x32xf32>
    %84 = arith.index_cast %c0_i32_27 : i32 to index
    %c0_32 = arith.constant 0 : index
    %85 = vector.load %arg7[%84, %c0_32] : memref<8x32xf32, #tpu.memory_space<vmem>>, vector<1x32xf32>
    tpu.vector_store %arg7[%84, %c0_32], %83 {strides = array<i32>} : memref<8x32xf32, #tpu.memory_space<vmem>>, vector<1x32xf32>,
    %c1_i32_33 = arith.constant 1 : i32
    %86 = arith.index_cast %c1_i32_33 : i32 to index
    %c0_34 = arith.constant 0 : index
    %87 = vector.load %arg10[%86, %c0_34] : memref<8x96xf32, #tpu.memory_space<vmem>>, vector<1x96xf32>
    %cst_35 = arith.constant dense<0.000000e+00> : vector<1x96xf32>
    %88 = tpu.matmul %83, %52, %cst_35 {dimension_numbers = #tpu.dot_dimension_numbers<[1], [0], [0], [1], [0, 0, 1, 1], [], []>} : vector<1x32xf32>, vector<32x96xf32>, vector<1x96xf32> -> vector<1x96xf32>
    %89 = vector.extract_strided_slice %87 {offsets = [0, 0], sizes = [1, 64], strides = [1, 1]} : vector<1x96xf32> to vector<1x64xf32>
    %90 = vector.extract_strided_slice %88 {offsets = [0, 0], sizes = [1, 64], strides = [1, 1]} : vector<1x96xf32> to vector<1x64xf32>
    %91 = arith.addf %89, %90 : vector<1x64xf32>
    %92 = vector.extract_strided_slice %53 {offsets = [0, 0], sizes = [1, 64], strides = [1, 1]} : vector<1x128xf32> to vector<1x64xf32>
    %93 = arith.addf %91, %92 : vector<1x64xf32>
    %94 = arith.negf %93 : vector<1x64xf32>
    %95 = math.exp %94 : vector<1x64xf32>
    %cst_36 = arith.constant 1.000000e+00 : f32
    %96 = vector.broadcast %cst_36 : f32 to vector<1x64xf32>
    %97 = arith.addf %96, %95 : vector<1x64xf32>
    %98 = arith.divf %96, %97 : vector<1x64xf32>
    %99 = vector.extract_strided_slice %98 {offsets = [0, 0], sizes = [1, 32], strides = [1, 1]} : vector<1x64xf32> to vector<1x32xf32>
    %100 = vector.extract_strided_slice %98 {offsets = [0, 32], sizes = [1, 32], strides = [1, 1]} : vector<1x64xf32> to vector<1x32xf32>
    %101 = vector.extract_strided_slice %87 {offsets = [0, 64], sizes = [1, 32], strides = [1, 1]} : vector<1x96xf32> to vector<1x32xf32>
    %102 = vector.extract_strided_slice %53 {offsets = [0, 64], sizes = [1, 32], strides = [1, 1]} : vector<1x128xf32> to vector<1x32xf32>
    %103 = arith.addf %101, %102 : vector<1x32xf32>
    %104 = vector.extract_strided_slice %88 {offsets = [0, 64], sizes = [1, 32], strides = [1, 1]} : vector<1x96xf32> to vector<1x32xf32>
    %105 = vector.extract_strided_slice %53 {offsets = [0, 96], sizes = [1, 32], strides = [1, 1]} : vector<1x128xf32> to vector<1x32xf32>
    %106 = arith.addf %104, %105 : vector<1x32xf32>
    %107 = arith.mulf %99, %106 : vector<1x32xf32>
    %108 = arith.addf %103, %107 : vector<1x32xf32>
    %109 = math.tanh %108 : vector<1x32xf32>
    %cst_37 = arith.constant 1.000000e+00 : f32
    %110 = vector.broadcast %cst_37 : f32 to vector<1x32xf32>
    %111 = arith.subf %110, %100 : vector<1x32xf32>
    %112 = arith.mulf %111, %109 : vector<1x32xf32>
    %113 = arith.mulf %100, %83 : vector<1x32xf32>
    %114 = arith.addf %112, %113 : vector<1x32xf32>
    %115 = arith.index_cast %c1_i32_33 : i32 to index
    %c0_38 = arith.constant 0 : index
    %116 = vector.load %arg7[%115, %c0_38] : memref<8x32xf32, #tpu.memory_space<vmem>>, vector<1x32xf32>
    tpu.vector_store %arg7[%115, %c0_38], %114 {strides = array<i32>} : memref<8x32xf32, #tpu.memory_space<vmem>>, vector<1x32xf32>,
    %c2_i32_39 = arith.constant 2 : i32
    %117 = arith.index_cast %c2_i32_39 : i32 to index
    %c0_40 = arith.constant 0 : index
    %118 = vector.load %arg10[%117, %c0_40] : memref<8x96xf32, #tpu.memory_space<vmem>>, vector<1x96xf32>
    %cst_41 = arith.constant dense<0.000000e+00> : vector<1x96xf32>
    %119 = tpu.matmul %114, %52, %cst_41 {dimension_numbers = #tpu.dot_dimension_numbers<[1], [0], [0], [1], [0, 0, 1, 1], [], []>} : vector<1x32xf32>, vector<32x96xf32>, vector<1x96xf32> -> vector<1x96xf32>
    %120 = vector.extract_strided_slice %118 {offsets = [0, 0], sizes = [1, 64], strides = [1, 1]} : vector<1x96xf32> to vector<1x64xf32>
    %121 = vector.extract_strided_slice %119 {offsets = [0, 0], sizes = [1, 64], strides = [1, 1]} : vector<1x96xf32> to vector<1x64xf32>
    %122 = arith.addf %120, %121 : vector<1x64xf32>
    %123 = vector.extract_strided_slice %53 {offsets = [0, 0], sizes = [1, 64], strides = [1, 1]} : vector<1x128xf32> to vector<1x64xf32>
    %124 = arith.addf %122, %123 : vector<1x64xf32>
    %125 = arith.negf %124 : vector<1x64xf32>
    %126 = math.exp %125 : vector<1x64xf32>
    %cst_42 = arith.constant 1.000000e+00 : f32
    %127 = vector.broadcast %cst_42 : f32 to vector<1x64xf32>
    %128 = arith.addf %127, %126 : vector<1x64xf32>
    %129 = arith.divf %127, %128 : vector<1x64xf32>
    %130 = vector.extract_strided_slice %129 {offsets = [0, 0], sizes = [1, 32], strides = [1, 1]} : vector<1x64xf32> to vector<1x32xf32>
    %131 = vector.extract_strided_slice %129 {offsets = [0, 32], sizes = [1, 32], strides = [1, 1]} : vector<1x64xf32> to vector<1x32xf32>
    %132 = vector.extract_strided_slice %118 {offsets = [0, 64], sizes = [1, 32], strides = [1, 1]} : vector<1x96xf32> to vector<1x32xf32>
    %133 = vector.extract_strided_slice %53 {offsets = [0, 64], sizes = [1, 32], strides = [1, 1]} : vector<1x128xf32> to vector<1x32xf32>
    %134 = arith.addf %132, %133 : vector<1x32xf32>
    %135 = vector.extract_strided_slice %119 {offsets = [0, 64], sizes = [1, 32], strides = [1, 1]} : vector<1x96xf32> to vector<1x32xf32>
    %136 = vector.extract_strided_slice %53 {offsets = [0, 96], sizes = [1, 32], strides = [1, 1]} : vector<1x128xf32> to vector<1x32xf32>
    %137 = arith.addf %135, %136 : vector<1x32xf32>
    %138 = arith.mulf %130, %137 : vector<1x32xf32>
    %139 = arith.addf %134, %138 : vector<1x32xf32>
    %140 = math.tanh %139 : vector<1x32xf32>
    %cst_43 = arith.constant 1.000000e+00 : f32
    %141 = vector.broadcast %cst_43 : f32 to vector<1x32xf32>
    %142 = arith.subf %141, %131 : vector<1x32xf32>
    %143 = arith.mulf %142, %140 : vector<1x32xf32>
    %144 = arith.mulf %131, %114 : vector<1x32xf32>
    %145 = arith.addf %143, %144 : vector<1x32xf32>
    %146 = arith.index_cast %c2_i32_39 : i32 to index
    %c0_44 = arith.constant 0 : index
    %147 = vector.load %arg7[%146, %c0_44] : memref<8x32xf32, #tpu.memory_space<vmem>>, vector<1x32xf32>
    tpu.vector_store %arg7[%146, %c0_44], %145 {strides = array<i32>} : memref<8x32xf32, #tpu.memory_space<vmem>>, vector<1x32xf32>,
    %c3_i32_45 = arith.constant 3 : i32
    %148 = arith.index_cast %c3_i32_45 : i32 to index
    %c0_46 = arith.constant 0 : index
    %149 = vector.load %arg10[%148, %c0_46] : memref<8x96xf32, #tpu.memory_space<vmem>>, vector<1x96xf32>
    %cst_47 = arith.constant dense<0.000000e+00> : vector<1x96xf32>
    %150 = tpu.matmul %145, %52, %cst_47 {dimension_numbers = #tpu.dot_dimension_numbers<[1], [0], [0], [1], [0, 0, 1, 1], [], []>} : vector<1x32xf32>, vector<32x96xf32>, vector<1x96xf32> -> vector<1x96xf32>
    %151 = vector.extract_strided_slice %149 {offsets = [0, 0], sizes = [1, 64], strides = [1, 1]} : vector<1x96xf32> to vector<1x64xf32>
    %152 = vector.extract_strided_slice %150 {offsets = [0, 0], sizes = [1, 64], strides = [1, 1]} : vector<1x96xf32> to vector<1x64xf32>
    %153 = arith.addf %151, %152 : vector<1x64xf32>
    %154 = vector.extract_strided_slice %53 {offsets = [0, 0], sizes = [1, 64], strides = [1, 1]} : vector<1x128xf32> to vector<1x64xf32>
    %155 = arith.addf %153, %154 : vector<1x64xf32>
    %156 = arith.negf %155 : vector<1x64xf32>
    %157 = math.exp %156 : vector<1x64xf32>
    %cst_48 = arith.constant 1.000000e+00 : f32
    %158 = vector.broadcast %cst_48 : f32 to vector<1x64xf32>
    %159 = arith.addf %158, %157 : vector<1x64xf32>
    %160 = arith.divf %158, %159 : vector<1x64xf32>
    %161 = vector.extract_strided_slice %160 {offsets = [0, 0], sizes = [1, 32], strides = [1, 1]} : vector<1x64xf32> to vector<1x32xf32>
    %162 = vector.extract_strided_slice %160 {offsets = [0, 32], sizes = [1, 32], strides = [1, 1]} : vector<1x64xf32> to vector<1x32xf32>
    %163 = vector.extract_strided_slice %149 {offsets = [0, 64], sizes = [1, 32], strides = [1, 1]} : vector<1x96xf32> to vector<1x32xf32>
    %164 = vector.extract_strided_slice %53 {offsets = [0, 64], sizes = [1, 32], strides = [1, 1]} : vector<1x128xf32> to vector<1x32xf32>
    %165 = arith.addf %163, %164 : vector<1x32xf32>
    %166 = vector.extract_strided_slice %150 {offsets = [0, 64], sizes = [1, 32], strides = [1, 1]} : vector<1x96xf32> to vector<1x32xf32>
    %167 = vector.extract_strided_slice %53 {offsets = [0, 96], sizes = [1, 32], strides = [1, 1]} : vector<1x128xf32> to vector<1x32xf32>
    %168 = arith.addf %166, %167 : vector<1x32xf32>
    %169 = arith.mulf %161, %168 : vector<1x32xf32>
    %170 = arith.addf %165, %169 : vector<1x32xf32>
    %171 = math.tanh %170 : vector<1x32xf32>
    %cst_49 = arith.constant 1.000000e+00 : f32
    %172 = vector.broadcast %cst_49 : f32 to vector<1x32xf32>
    %173 = arith.subf %172, %162 : vector<1x32xf32>
    %174 = arith.mulf %173, %171 : vector<1x32xf32>
    %175 = arith.mulf %162, %145 : vector<1x32xf32>
    %176 = arith.addf %174, %175 : vector<1x32xf32>
    %177 = arith.index_cast %c3_i32_45 : i32 to index
    %c0_50 = arith.constant 0 : index
    %178 = vector.load %arg7[%177, %c0_50] : memref<8x32xf32, #tpu.memory_space<vmem>>, vector<1x32xf32>
    tpu.vector_store %arg7[%177, %c0_50], %176 {strides = array<i32>} : memref<8x32xf32, #tpu.memory_space<vmem>>, vector<1x32xf32>,
    %c4_i32_51 = arith.constant 4 : i32
    %179 = arith.index_cast %c4_i32_51 : i32 to index
    %c0_52 = arith.constant 0 : index
    %180 = vector.load %arg10[%179, %c0_52] : memref<8x96xf32, #tpu.memory_space<vmem>>, vector<1x96xf32>
    %cst_53 = arith.constant dense<0.000000e+00> : vector<1x96xf32>
    %181 = tpu.matmul %176, %52, %cst_53 {dimension_numbers = #tpu.dot_dimension_numbers<[1], [0], [0], [1], [0, 0, 1, 1], [], []>} : vector<1x32xf32>, vector<32x96xf32>, vector<1x96xf32> -> vector<1x96xf32>
    %182 = vector.extract_strided_slice %180 {offsets = [0, 0], sizes = [1, 64], strides = [1, 1]} : vector<1x96xf32> to vector<1x64xf32>
    %183 = vector.extract_strided_slice %181 {offsets = [0, 0], sizes = [1, 64], strides = [1, 1]} : vector<1x96xf32> to vector<1x64xf32>
    %184 = arith.addf %182, %183 : vector<1x64xf32>
    %185 = vector.extract_strided_slice %53 {offsets = [0, 0], sizes = [1, 64], strides = [1, 1]} : vector<1x128xf32> to vector<1x64xf32>
    %186 = arith.addf %184, %185 : vector<1x64xf32>
    %187 = arith.negf %186 : vector<1x64xf32>
    %188 = math.exp %187 : vector<1x64xf32>
    %cst_54 = arith.constant 1.000000e+00 : f32
    %189 = vector.broadcast %cst_54 : f32 to vector<1x64xf32>
    %190 = arith.addf %189, %188 : vector<1x64xf32>
    %191 = arith.divf %189, %190 : vector<1x64xf32>
    %192 = vector.extract_strided_slice %191 {offsets = [0, 0], sizes = [1, 32], strides = [1, 1]} : vector<1x64xf32> to vector<1x32xf32>
    %193 = vector.extract_strided_slice %191 {offsets = [0, 32], sizes = [1, 32], strides = [1, 1]} : vector<1x64xf32> to vector<1x32xf32>
    %194 = vector.extract_strided_slice %180 {offsets = [0, 64], sizes = [1, 32], strides = [1, 1]} : vector<1x96xf32> to vector<1x32xf32>
    %195 = vector.extract_strided_slice %53 {offsets = [0, 64], sizes = [1, 32], strides = [1, 1]} : vector<1x128xf32> to vector<1x32xf32>
    %196 = arith.addf %194, %195 : vector<1x32xf32>
    %197 = vector.extract_strided_slice %181 {offsets = [0, 64], sizes = [1, 32], strides = [1, 1]} : vector<1x96xf32> to vector<1x32xf32>
    %198 = vector.extract_strided_slice %53 {offsets = [0, 96], sizes = [1, 32], strides = [1, 1]} : vector<1x128xf32> to vector<1x32xf32>
    %199 = arith.addf %197, %198 : vector<1x32xf32>
    %200 = arith.mulf %192, %199 : vector<1x32xf32>
    %201 = arith.addf %196, %200 : vector<1x32xf32>
    %202 = math.tanh %201 : vector<1x32xf32>
    %cst_55 = arith.constant 1.000000e+00 : f32
    %203 = vector.broadcast %cst_55 : f32 to vector<1x32xf32>
    %204 = arith.subf %203, %193 : vector<1x32xf32>
    %205 = arith.mulf %204, %202 : vector<1x32xf32>
    %206 = arith.mulf %193, %176 : vector<1x32xf32>
    %207 = arith.addf %205, %206 : vector<1x32xf32>
    %208 = arith.index_cast %c4_i32_51 : i32 to index
    %c0_56 = arith.constant 0 : index
    %209 = vector.load %arg7[%208, %c0_56] : memref<8x32xf32, #tpu.memory_space<vmem>>, vector<1x32xf32>
    tpu.vector_store %arg7[%208, %c0_56], %207 {strides = array<i32>} : memref<8x32xf32, #tpu.memory_space<vmem>>, vector<1x32xf32>,
    %c5_i32_57 = arith.constant 5 : i32
    %210 = arith.index_cast %c5_i32_57 : i32 to index
    %c0_58 = arith.constant 0 : index
    %211 = vector.load %arg10[%210, %c0_58] : memref<8x96xf32, #tpu.memory_space<vmem>>, vector<1x96xf32>
    %cst_59 = arith.constant dense<0.000000e+00> : vector<1x96xf32>
    %212 = tpu.matmul %207, %52, %cst_59 {dimension_numbers = #tpu.dot_dimension_numbers<[1], [0], [0], [1], [0, 0, 1, 1], [], []>} : vector<1x32xf32>, vector<32x96xf32>, vector<1x96xf32> -> vector<1x96xf32>
    %213 = vector.extract_strided_slice %211 {offsets = [0, 0], sizes = [1, 64], strides = [1, 1]} : vector<1x96xf32> to vector<1x64xf32>
    %214 = vector.extract_strided_slice %212 {offsets = [0, 0], sizes = [1, 64], strides = [1, 1]} : vector<1x96xf32> to vector<1x64xf32>
    %215 = arith.addf %213, %214 : vector<1x64xf32>
    %216 = vector.extract_strided_slice %53 {offsets = [0, 0], sizes = [1, 64], strides = [1, 1]} : vector<1x128xf32> to vector<1x64xf32>
    %217 = arith.addf %215, %216 : vector<1x64xf32>
    %218 = arith.negf %217 : vector<1x64xf32>
    %219 = math.exp %218 : vector<1x64xf32>
    %cst_60 = arith.constant 1.000000e+00 : f32
    %220 = vector.broadcast %cst_60 : f32 to vector<1x64xf32>
    %221 = arith.addf %220, %219 : vector<1x64xf32>
    %222 = arith.divf %220, %221 : vector<1x64xf32>
    %223 = vector.extract_strided_slice %222 {offsets = [0, 0], sizes = [1, 32], strides = [1, 1]} : vector<1x64xf32> to vector<1x32xf32>
    %224 = vector.extract_strided_slice %222 {offsets = [0, 32], sizes = [1, 32], strides = [1, 1]} : vector<1x64xf32> to vector<1x32xf32>
    %225 = vector.extract_strided_slice %211 {offsets = [0, 64], sizes = [1, 32], strides = [1, 1]} : vector<1x96xf32> to vector<1x32xf32>
    %226 = vector.extract_strided_slice %53 {offsets = [0, 64], sizes = [1, 32], strides = [1, 1]} : vector<1x128xf32> to vector<1x32xf32>
    %227 = arith.addf %225, %226 : vector<1x32xf32>
    %228 = vector.extract_strided_slice %212 {offsets = [0, 64], sizes = [1, 32], strides = [1, 1]} : vector<1x96xf32> to vector<1x32xf32>
    %229 = vector.extract_strided_slice %53 {offsets = [0, 96], sizes = [1, 32], strides = [1, 1]} : vector<1x128xf32> to vector<1x32xf32>
    %230 = arith.addf %228, %229 : vector<1x32xf32>
    %231 = arith.mulf %223, %230 : vector<1x32xf32>
    %232 = arith.addf %227, %231 : vector<1x32xf32>
    %233 = math.tanh %232 : vector<1x32xf32>
    %cst_61 = arith.constant 1.000000e+00 : f32
    %234 = vector.broadcast %cst_61 : f32 to vector<1x32xf32>
    %235 = arith.subf %234, %224 : vector<1x32xf32>
    %236 = arith.mulf %235, %233 : vector<1x32xf32>
    %237 = arith.mulf %224, %207 : vector<1x32xf32>
    %238 = arith.addf %236, %237 : vector<1x32xf32>
    %239 = arith.index_cast %c5_i32_57 : i32 to index
    %c0_62 = arith.constant 0 : index
    %240 = vector.load %arg7[%239, %c0_62] : memref<8x32xf32, #tpu.memory_space<vmem>>, vector<1x32xf32>
    tpu.vector_store %arg7[%239, %c0_62], %238 {strides = array<i32>} : memref<8x32xf32, #tpu.memory_space<vmem>>, vector<1x32xf32>,
    %c6_i32_63 = arith.constant 6 : i32
    %241 = arith.index_cast %c6_i32_63 : i32 to index
    %c0_64 = arith.constant 0 : index
    %242 = vector.load %arg10[%241, %c0_64] : memref<8x96xf32, #tpu.memory_space<vmem>>, vector<1x96xf32>
    %cst_65 = arith.constant dense<0.000000e+00> : vector<1x96xf32>
    %243 = tpu.matmul %238, %52, %cst_65 {dimension_numbers = #tpu.dot_dimension_numbers<[1], [0], [0], [1], [0, 0, 1, 1], [], []>} : vector<1x32xf32>, vector<32x96xf32>, vector<1x96xf32> -> vector<1x96xf32>
    %244 = vector.extract_strided_slice %242 {offsets = [0, 0], sizes = [1, 64], strides = [1, 1]} : vector<1x96xf32> to vector<1x64xf32>
    %245 = vector.extract_strided_slice %243 {offsets = [0, 0], sizes = [1, 64], strides = [1, 1]} : vector<1x96xf32> to vector<1x64xf32>
    %246 = arith.addf %244, %245 : vector<1x64xf32>
    %247 = vector.extract_strided_slice %53 {offsets = [0, 0], sizes = [1, 64], strides = [1, 1]} : vector<1x128xf32> to vector<1x64xf32>
    %248 = arith.addf %246, %247 : vector<1x64xf32>
    %249 = arith.negf %248 : vector<1x64xf32>
    %250 = math.exp %249 : vector<1x64xf32>
    %cst_66 = arith.constant 1.000000e+00 : f32
    %251 = vector.broadcast %cst_66 : f32 to vector<1x64xf32>
    %252 = arith.addf %251, %250 : vector<1x64xf32>
    %253 = arith.divf %251, %252 : vector<1x64xf32>
    %254 = vector.extract_strided_slice %253 {offsets = [0, 0], sizes = [1, 32], strides = [1, 1]} : vector<1x64xf32> to vector<1x32xf32>
    %255 = vector.extract_strided_slice %253 {offsets = [0, 32], sizes = [1, 32], strides = [1, 1]} : vector<1x64xf32> to vector<1x32xf32>
    %256 = vector.extract_strided_slice %242 {offsets = [0, 64], sizes = [1, 32], strides = [1, 1]} : vector<1x96xf32> to vector<1x32xf32>
    %257 = vector.extract_strided_slice %53 {offsets = [0, 64], sizes = [1, 32], strides = [1, 1]} : vector<1x128xf32> to vector<1x32xf32>
    %258 = arith.addf %256, %257 : vector<1x32xf32>
    %259 = vector.extract_strided_slice %243 {offsets = [0, 64], sizes = [1, 32], strides = [1, 1]} : vector<1x96xf32> to vector<1x32xf32>
    %260 = vector.extract_strided_slice %53 {offsets = [0, 96], sizes = [1, 32], strides = [1, 1]} : vector<1x128xf32> to vector<1x32xf32>
    %261 = arith.addf %259, %260 : vector<1x32xf32>
    %262 = arith.mulf %254, %261 : vector<1x32xf32>
    %263 = arith.addf %258, %262 : vector<1x32xf32>
    %264 = math.tanh %263 : vector<1x32xf32>
    %cst_67 = arith.constant 1.000000e+00 : f32
    %265 = vector.broadcast %cst_67 : f32 to vector<1x32xf32>
    %266 = arith.subf %265, %255 : vector<1x32xf32>
    %267 = arith.mulf %266, %264 : vector<1x32xf32>
    %268 = arith.mulf %255, %238 : vector<1x32xf32>
    %269 = arith.addf %267, %268 : vector<1x32xf32>
    %270 = arith.index_cast %c6_i32_63 : i32 to index
    %c0_68 = arith.constant 0 : index
    %271 = vector.load %arg7[%270, %c0_68] : memref<8x32xf32, #tpu.memory_space<vmem>>, vector<1x32xf32>
    tpu.vector_store %arg7[%270, %c0_68], %269 {strides = array<i32>} : memref<8x32xf32, #tpu.memory_space<vmem>>, vector<1x32xf32>,
    %c7_i32_69 = arith.constant 7 : i32
    %272 = arith.index_cast %c7_i32_69 : i32 to index
    %c0_70 = arith.constant 0 : index
    %273 = vector.load %arg10[%272, %c0_70] : memref<8x96xf32, #tpu.memory_space<vmem>>, vector<1x96xf32>
    %cst_71 = arith.constant dense<0.000000e+00> : vector<1x96xf32>
    %274 = tpu.matmul %269, %52, %cst_71 {dimension_numbers = #tpu.dot_dimension_numbers<[1], [0], [0], [1], [0, 0, 1, 1], [], []>} : vector<1x32xf32>, vector<32x96xf32>, vector<1x96xf32> -> vector<1x96xf32>
    %275 = vector.extract_strided_slice %273 {offsets = [0, 0], sizes = [1, 64], strides = [1, 1]} : vector<1x96xf32> to vector<1x64xf32>
    %276 = vector.extract_strided_slice %274 {offsets = [0, 0], sizes = [1, 64], strides = [1, 1]} : vector<1x96xf32> to vector<1x64xf32>
    %277 = arith.addf %275, %276 : vector<1x64xf32>
    %278 = vector.extract_strided_slice %53 {offsets = [0, 0], sizes = [1, 64], strides = [1, 1]} : vector<1x128xf32> to vector<1x64xf32>
    %279 = arith.addf %277, %278 : vector<1x64xf32>
    %280 = arith.negf %279 : vector<1x64xf32>
    %281 = math.exp %280 : vector<1x64xf32>
    %cst_72 = arith.constant 1.000000e+00 : f32
    %282 = vector.broadcast %cst_72 : f32 to vector<1x64xf32>
    %283 = arith.addf %282, %281 : vector<1x64xf32>
    %284 = arith.divf %282, %283 : vector<1x64xf32>
    %285 = vector.extract_strided_slice %284 {offsets = [0, 0], sizes = [1, 32], strides = [1, 1]} : vector<1x64xf32> to vector<1x32xf32>
    %286 = vector.extract_strided_slice %284 {offsets = [0, 32], sizes = [1, 32], strides = [1, 1]} : vector<1x64xf32> to vector<1x32xf32>
    %287 = vector.extract_strided_slice %273 {offsets = [0, 64], sizes = [1, 32], strides = [1, 1]} : vector<1x96xf32> to vector<1x32xf32>
    %288 = vector.extract_strided_slice %53 {offsets = [0, 64], sizes = [1, 32], strides = [1, 1]} : vector<1x128xf32> to vector<1x32xf32>
    %289 = arith.addf %287, %288 : vector<1x32xf32>
    %290 = vector.extract_strided_slice %274 {offsets = [0, 64], sizes = [1, 32], strides = [1, 1]} : vector<1x96xf32> to vector<1x32xf32>
    %291 = vector.extract_strided_slice %53 {offsets = [0, 96], sizes = [1, 32], strides = [1, 1]} : vector<1x128xf32> to vector<1x32xf32>
    %292 = arith.addf %290, %291 : vector<1x32xf32>
    %293 = arith.mulf %285, %292 : vector<1x32xf32>
    %294 = arith.addf %289, %293 : vector<1x32xf32>
    %295 = math.tanh %294 : vector<1x32xf32>
    %cst_73 = arith.constant 1.000000e+00 : f32
    %296 = vector.broadcast %cst_73 : f32 to vector<1x32xf32>
    %297 = arith.subf %296, %286 : vector<1x32xf32>
    %298 = arith.mulf %297, %295 : vector<1x32xf32>
    %299 = arith.mulf %286, %269 : vector<1x32xf32>
    %300 = arith.addf %298, %299 : vector<1x32xf32>
    %301 = arith.index_cast %c7_i32_69 : i32 to index
    %c0_74 = arith.constant 0 : index
    %302 = vector.load %arg7[%301, %c0_74] : memref<8x32xf32, #tpu.memory_space<vmem>>, vector<1x32xf32>
    tpu.vector_store %arg7[%301, %c0_74], %300 {strides = array<i32>} : memref<8x32xf32, #tpu.memory_space<vmem>>, vector<1x32xf32>,
    %c8_i32_75 = arith.constant 8 : i32
    %c0_76 = arith.constant 0 : index
    %c0_77 = arith.constant 0 : index
    %303 = vector.load %arg8[%c0_76, %c0_77] : memref<1x32xf32, #tpu.memory_space<vmem>>, vector<1x32xf32>
    tpu.vector_store %arg8[%c0_76, %c0_77], %300 {strides = array<i32>} : memref<1x32xf32, #tpu.memory_space<vmem>>, vector<1x32xf32>,
    return
  }
  func.func @transform_0(%arg0: i32, %arg1: memref<8xi32, #tpu.memory_space<smem>>) -> (i32, i32) {
    %c0_i32 = arith.constant 0 : i32
    %c0_i32_0 = arith.constant 0 : i32
    %c0_i32_1 = arith.constant 0 : i32
    return %c0_i32, %c0_i32_0 : i32, i32
  }
  func.func @transform_1(%arg0: i32, %arg1: memref<8xi32, #tpu.memory_space<smem>>) -> (i32, i32) {
    %c0_i32 = arith.constant 0 : i32
    %c0_i32_0 = arith.constant 0 : i32
    %c0_i32_1 = arith.constant 0 : i32
    return %c0_i32, %c0_i32_0 : i32, i32
  }
  func.func @transform_2(%arg0: i32, %arg1: memref<8xi32, #tpu.memory_space<smem>>) -> (i32, i32) {
    %c0_i32 = arith.constant 0 : i32
    %c0_i32_0 = arith.constant 0 : i32
    %c0_i32_1 = arith.constant 0 : i32
    return %c0_i32, %c0_i32_0 : i32, i32
  }
  func.func @transform_3(%arg0: i32, %arg1: memref<8xi32, #tpu.memory_space<smem>>) -> (i32, i32) {
    %c0_i32 = arith.constant 0 : i32
    %c0_i32_0 = arith.constant 0 : i32
    %c0_i32_1 = arith.constant 0 : i32
    return %c0_i32, %c0_i32_0 : i32, i32
  }
  func.func @transform_4(%arg0: i32, %arg1: memref<8xi32, #tpu.memory_space<smem>>) -> (i32, i32) {
    %c0_i32 = arith.constant 0 : i32
    %c0_i32_0 = arith.constant 0 : i32
    %c0_i32_1 = arith.constant 0 : i32
    return %c0_i32, %c0_i32_0 : i32, i32
  }
  func.func @transform_5(%arg0: i32, %arg1: memref<8xi32, #tpu.memory_space<smem>>) -> (i32, i32) {
    %c0_i32 = arith.constant 0 : i32
    %c0_i32_0 = arith.constant 0 : i32
    %c0_i32_1 = arith.constant 0 : i32
    return %c0_i32, %c0_i32_0 : i32, i32
  }
  func.func @transform_6(%arg0: i32, %arg1: memref<8xi32, #tpu.memory_space<smem>>) -> (i32, i32) {
    %c0_i32 = arith.constant 0 : i32
    %c0_i32_0 = arith.constant 0 : i32
    %c0_i32_1 = arith.constant 0 : i32
    return %c0_i32, %c0_i32_0 : i32, i32
  }
}

</mosaic_0001>

<bundles_post_ra>
// kernel: tpu_custom_call.1
= control target key start
LH: loop header
LB: loop body
LE: loop exit
PB: predicated region body
PF: predicated region fallthrough
CT: control target
= control target key end

     0   :  { %s1710_s0 = inlined_call_operand.vmem [shape: s32[8], index: 0, kind: input, shape index: {}]   ;;  %s1711_s1 = inlined_call_operand.vmem [shape: f32[64,32], index: 1, kind: input, shape index: {}]   ;;  %s1712_s2 = inlined_call_operand.vmem [shape: f32[1,32], index: 2, kind: input, shape index: {}]   ;;  %s1713_s3 = inlined_call_operand.vmem [shape: f32[32,96], index: 3, kind: input, shape index: {}]   ;;  %s1714_s4 = inlined_call_operand.vmem [shape: f32[32,96], index: 4, kind: input, shape index: {}]   ;;  %s1715_s5 = inlined_call_operand.vmem [shape: f32[1,128], index: 5, kind: input, shape index: {}]   ;;  %s1716_s6 = inlined_call_operand.hbm [shape: f32[8,32], index: 6, kind: output, shape index: {0}]   ;;  %s1717_s7 = inlined_call_operand.hbm [shape: f32[1,32], index: 7, kind: output, shape index: {1}]  }
   0x1   :  { %s13_s26 = sshll.u32 %s1710_s0, 4  ;;  %s14_s26 = int_to_ptr.vmem [resolvable:$true] %s13_s26 }
   0x2   :  { %s1339_s27 = scalar_lea.vmem %s14_s26, 16  ;;  %p1344_p1 = scmp.lt.s32.totalorder %s14_s26, %s14_s26 }
   0x3   :  { %p1340_p0 = scmp.ne.s32.totalorder %s14_s26, %s1339_s27  ;;  %p1345_p2 = scmp.lt.s32.totalorder %s1339_s27, %s1339_s27 }
   0x5   :  { %p1346_p3 = por %p1345_p2, %p1344_p1 }
   0x7   :  { %p1347_p4 = pnand %p1346_p3, %p1340_p0 }
   0x9   :  { %1350 = shalt.err (!%p1347_p4)  }
   0xa   :  { %s1401_s28 = smov [#allocation5]  }
   0xb   :  { %16 = dma.vmem_to_smem %s14_s26, 16, %s1401_s28, [#allocation4] }
   0xc   :  { %1395 = dma.done.wait [#allocation4], 16 }
   0xd   :  { %1396 = vsyncadd [#allocation4], 4294967280 }
   0xe   :  { %18 = sfence }
   0xf   :  { %19 = vsyncpa [#allocation7], 0  ;;  %v145_v0 = vld [vmem:[%s1714_s4] sm:$0xff]  ;;  %v146_v1 = vld [vmem:[%s1714_s4 + $0x8] sm:$0xff]  ;;  %v235_v3 = vlaneseq  ;;  %v1402_v4 = vmov 0.0|0.0   ;;  %s1475_s17 = sld [smem:[#allocation5]] }
  0x10   :  { %v147_v2 = vld [vmem:[%s1714_s4 + $0x10] sm:$0xff]  ;;  %1234 = vmatprep.subr.bf16.mxu1 %v1402_v4  ;;  %v1463_v5 = vpack.c.bf16 %v146_v1, %v145_v0  ;;  %v148_v6 = vld [vmem:[%s1714_s4 + $0x18] sm:$0xff]  ;;  %1228 = vmatprep.subr.bf16.mxu0 %v1402_v4  ;;  %v65_v7 = vld [vmem:[%s1713_s3] sm:$0xff]  ;;  %vm1403_vm0 = vmmov 0   ;;  %v1404_v10 = vmov 0.0   ;;  %s1492_s21 = sld [smem:[#allocation5 + $0x1]] }
  0x11   :  { %v66_v8 = vld [vmem:[%s1713_s3 + $0x8] sm:$0xff]  ;;  %1148 = vmatprep.mubr.msk.f32.mxu1 %vm1403_vm0, %v1404_v10  ;;  %v67_v11 = vld [vmem:[%s1713_s3 + $0x10] sm:$0xff]  ;;  %v68_v12 = vld [vmem:[%s1713_s3 + $0x18] sm:$0xff]  ;;  %1137 = vmatprep.mubr.msk.f32.mxu0 %vm1403_vm0, %v1404_v10  ;;  %v1487_v13 = vshrl.u32 %v235_v3, 7  ;;  %v1490_v14 = vpack.c.bf16 %v148_v6, %v147_v2  ;;  %s1494_s22 = sld [smem:[#allocation5 + $0x2]]  ;;  %s1502_s3 = sld [smem:[#allocation5 + $0x3]] }
  0x12   :  { %v1229_v9 = vpack.c.bf16 %v66_v8, %v65_v7  ;;  %1236 = vmatpush3.bf16.msra.mxu1 %v1463_v5  ;;  %v1499_v15 = vld [vmem:[%s1715_s5] sm:$0x1]  ;;  %v1232_v16 = vpack.c.bf16 %v68_v12, %v67_v11  ;;  %s1504_s25 = sld [smem:[#allocation5 + $0x4]]  ;;  %s1508_s26 = sld [smem:[#allocation5 + $0x5]] }
  0x13   :  { %1237 = vmatprep.subr.bf16.mxu1 %v1402_v4  ;;  %v237_v17 = vsub.s32 0, %v1487_v13  ;;  %s1510_s27 = sld [smem:[#allocation5 + $0x6]] }
  0x14   :  { %1230 = vmatpush3.bf16.msra.mxu0 %v1229_v9 }
  0x15   :  { %1231 = vmatprep.subr.bf16.mxu0 %v1402_v4 }
  0x16   :  { %20 = vsyncpa [#allocation9], 0  ;;  %vm34_vm1 = vcmask 253952   ;;  %s1512_s5 = sld [smem:[#allocation5 + $0x7]]  ;;  %v238_v18 = vrot.slane %v1499_v15, %v237_v17  ;;  %1239 = vmatpush3.bf16.msra.mxu1 %v1490_v14  ;;  %vm69_vm2 = vcmask 261120   ;;  %s32_s0 = scalar_lea.vmem %s1711_s1, %s1475_s17  ;;  %vm143_vm3 = vcmask 785408  }
  0x17   :  { %v150_v19 = vld [vmem:[%s1712_s2] sm:$0x1]  ;;  %s1405_s9 = smov 96   ;;  %s37_s12 = scalar_lea.vmem %s1711_s1, %s1492_s21  ;;  %1246 = vmatprep.subr.bf16.mxu1 %v1402_v4 }
  0x18   :  { %1233 = vmatpush3.bf16.msra.mxu0 %v1232_v16  ;;  %v33_v20 = vld [vmem:[%s32_s0] sm:$0x1]  ;;  %239 = vrot.lane.b32.xlu0 %v238_v18, %s1405_s9  ;;  %s41_s2 = scalar_lea.vmem %s1711_s1, %s1494_s22  ;;  %s45_s17 = scalar_lea.vmem %s1711_s1, %s1502_s3  ;;  %v263_v33 = vrot.slane %v150_v19, %v237_v17 }
  0x19   :  { %35 = vst.msk [vmem:[#allocation2] sm:$0x1] %vm34_vm1, %v33_v20  ;;  %1240 = vmatprep.subr.bf16.mxu0 %v1402_v4  ;;  %1149 = vmatmul.mubr.msk.f32.vlgmr.msra.gmra.mrb[0].mxu1 %vm69_vm2, %v150_v19  ;;  %v38_v21 = vld [vmem:[%s37_s12] sm:$0x1]  ;;  %s49_s19 = scalar_lea.vmem %s1711_s1, %s1504_s25  ;;  %s53_s22 = scalar_lea.vmem %s1711_s1, %s1508_s26 }
  0x1a   :  { %v42_v22 = vld [vmem:[%s41_s2] sm:$0x1]  ;;  %39 = vst.msk [vmem:[#allocation2 + $0x1] sm:$0x1] %vm34_vm1, %v38_v21  ;;  %s57_s28 = scalar_lea.vmem %s1711_s1, %s1510_s27  ;;  %1248 = vmatpush3.bf16.msra.mxu1 %v1463_v5  ;;  %1170 = vmatprep.mubr.msk.f32.mxu1 %vm1403_vm0, %v1404_v10  ;;  %s1407_s26 = smov 32  }
  0x1b   :  { %43 = vst.msk [vmem:[#allocation2 + $0x2] sm:$0x1] %vm34_vm1, %v42_v22  ;;  %v46_v23 = vld [vmem:[%s45_s17] sm:$0x1]  ;;  %1249 = vmatprep.subr.bf16.mxu1 %v1402_v4  ;;  %s1408_s27 = smov [#allocation6]   ;;  %s1409_s30 = smov [#allocation8]  }
  0x1c   :  { %v50_v24 = vld [vmem:[%s49_s19] sm:$0x1]  ;;  %47 = vst.msk [vmem:[#allocation2 + $0x3] sm:$0x1] %vm34_vm1, %v46_v23  ;;  %s61_s29 = scalar_lea.vmem %s1711_s1, %s1512_s5  ;;  %s1406_s1 = smov 64  }
  0x1d   :  { %51 = vst.msk [vmem:[#allocation2 + $0x4] sm:$0x1] %vm34_vm1, %v50_v24  ;;  %v54_v25 = vld [vmem:[%s53_s22] sm:$0x1]  ;;  %s1030_s5 = sshll.u32 %s1408_s27, 4  ;;  %s1040_s8 = sshll.u32 %s1409_s30, 4  ;;  %s1031_s5 = int_to_ptr.vmem [resolvable:$true] %s1030_s5  ;;  %s1676_s8 = int_to_ptr.vmem [resolvable:$true] %s1040_s8 }
  0x1e   :  { %v58_v26 = vld [vmem:[%s57_s28] sm:$0x1]  ;;  %55 = vst.msk [vmem:[#allocation2 + $0x5] sm:$0x1] %vm34_vm1, %v54_v25  ;;  %1251 = vmatpush3.bf16.msra.mxu1 %v1490_v14  ;;  %s1351_s0 = scalar_lea.vmem %s1031_s5, 128  ;;  %p1356_p6 = scmp.lt.s32.totalorder %s1031_s5, %s1031_s5 }
  0x1f   :  { %59 = vst.msk [vmem:[#allocation2 + $0x6] sm:$0x1] %vm34_vm1, %v58_v26  ;;  %v62_v27 = vld [vmem:[%s61_s29] sm:$0x1]  ;;  %1258 = vmatprep.subr.bf16.mxu1 %v1402_v4  ;;  %p1352_p5 = scmp.ne.s32.totalorder %s1031_s5, %s1351_s0  ;;  %p1357_p7 = scmp.lt.s32.totalorder %s1351_s0, %s1351_s0 }
  0x20   :  { %63 = vst.msk [vmem:[#allocation2 + $0x7] sm:$0x1] %vm34_vm1, %v62_v27 }
  0x21   :  { %p1358_p8 = por %p1357_p7, %p1356_p6 }
  0x23   :  { %p1359_p9 = pnand %p1358_p8, %p1352_p5 }
  0x27   :  { %v64_v28 = vld [vmem:[#allocation2] sm:$0xff] }
  0x28   :  { %1138 = vmatmul.mubr.msk.f32.vlgmr.msra.gmra.mrb[0].mxu0 %vm69_vm2, %v64_v28 }
  0x29   :  { %1242 = vmatpush3.bf16.msra.mxu0 %v1463_v5  ;;  %1159 = vmatprep.mubr.msk.f32.mxu0 %vm1403_vm0, %v1404_v10 }
  0x2a   :  { %1243 = vmatprep.subr.bf16.mxu0 %v1402_v4 }
  0x2d   :  { %1245 = vmatpush3.bf16.msra.mxu0 %v1490_v14 }
  0x2e   :  { %1252 = vmatprep.subr.bf16.mxu0 %v1402_v4 }
  0x8a   :  { %v1576_v29 = vpop.permute.xlu0 %239 }
  0xec   :  { %v221_v30 = vpop.f32.mrb[0].mxu1 }
  0xed   :  { %v242_v31 = vadd.f32 %v1576_v29, %v221_v30  ;;  %v1150_v32 = vpop.f32.mrb[1].mxu1 }
  0xef   :  { %244 = vrot.lane.b32.xlu0 %v242_v31, %s1406_s1 }
  0xf3   :  { %264 = vrot.lane.b32.xlu0 %v263_v33, %s1407_s26 }
  0xfb   :  { %v139_v34 = vpop.f32.mrb[0].mxu0 }
  0xfc   :  { %144 = vst.msk [vmem:[#allocation3] sm:$0xff] %vm143_vm3, %v139_v34  ;;  %v1139_v35 = vpop.f32.mrb[1].mxu0 }
 0x103   :  { %v151_v36 = vld [vmem:[#allocation3] sm:$0x1]  ;;  %v274_v59 = vld [vmem:[#allocation3 + $0x1] sm:$0x1]  ;;  %v381_v22 = vld [vmem:[#allocation3 + $0x2] sm:$0x1] }
 0x104   :  { %v225_v37 = vadd.f32 %v221_v30, %v151_v36  ;;  %v233_v45 = vadd.f32 %v151_v36, %v1499_v15  ;;  %v355_v6 = vadd.f32 %v274_v59, %v1499_v15  ;;  %v462_v32 = vadd.f32 %v381_v22, %v1499_v15 }
 0x106   :  { %v226_v38 = vadd.f32 %v225_v37, %v1499_v15 }
 0x108   :  { %v1069_v39 = vmul.f32 -1.442695, %v226_v38 }
 0x10a   :  { %1291 = vpow2.f32 %v1069_v39 }
 0x114   :  { %v1292_v40 = vpop.eup %1291 }
 0x115   :  { %v230_v41 = vadd.f32 1.0, %v1292_v40 }
 0x117   :  { %1293 = vrcp.f32 %v230_v41 }
 0x121   :  { %v1294_v42 = vpop.eup %1293 }
 0x122   :  { %v254_v50 = vsub.f32 1.0, %v1294_v42 }
 0x161   :  { %v245_v43 = vpop.permute.xlu0 %244 }
 0x162   :  { %v247_v44 = vmul.f32 %v1294_v42, %v245_v43 }
 0x164   :  { %249 = vrot.lane.b32.xlu1 %v247_v44, %s1406_s1 }
 0x165   :  { %v265_v49 = vpop.permute.xlu0 %264 }
 0x166   :  { %v267_v52 = vmul.f32 %v1294_v42, %v265_v49 }
 0x1d6   :  { %v250_v46 = vpop.permute.xlu1 %249 }
 0x1d7   :  { %v252_v47 = vadd.f32 %v250_v46, %v233_v45  ;;  %v488_v45 = vld [vmem:[#allocation3 + $0x3] sm:$0x1] }
 0x1d9   :  { %1295 = vtanh.f32 %v252_v47 }
 0x1e3   :  { %v1296_v48 = vpop.eup %1295 }
 0x1e4   :  { %256 = vrot.lane.b32.xlu1 %v1296_v48, %s1405_s9 }
 0x256   :  { %v257_v51 = vpop.permute.xlu1 %256 }
 0x257   :  { %v259_v53 = vmul.f32 %v257_v51, %v254_v50 }
 0x259   :  { %v268_v54 = vadd.f32 %v267_v52, %v259_v53 }
 0x25b   :  { %270 = vrot.lane.b32.xlu1 %v268_v54, %s1405_s9 }
 0x2cd   :  { %v271_v55 = vpop.permute.xlu1 %270 }
 0x2ce   :  { %273 = vst.msk [vmem:[#allocation6] sm:$0x1] %vm34_vm1, %v271_v55  ;;  %1160 = vmatmul.mubr.msk.f32.vlgmr.msra.gmra.mrb[2].mxu0 %vm69_vm2, %v271_v55 }
 0x2cf   :  { %1254 = vmatpush3.bf16.msra.mxu0 %v1463_v5  ;;  %1181 = vmatprep.mubr.msk.f32.mxu0 %vm1403_vm0, %v1404_v10 }
 0x2d0   :  { %1255 = vmatprep.subr.bf16.mxu0 %v1402_v4 }
 0x2d3   :  { %1257 = vmatpush3.bf16.msra.mxu0 %v1490_v14 }
 0x2d4   :  { %1264 = vmatprep.subr.bf16.mxu0 %v1402_v4 }
 0x3a1   :  { %v343_v56 = vpop.f32.mrb[2].mxu0 }
 0x3a2   :  { %v356_v57 = vadd.f32 %v343_v56, %v1576_v29  ;;  %v1161_v58 = vpop.f32.mrb[3].mxu0  ;;  %v347_v60 = vadd.f32 %v343_v56, %v274_v59 }
 0x3a4   :  { %358 = vrot.lane.b32.xlu0 %v356_v57, %s1406_s1  ;;  %v348_v61 = vadd.f32 %v347_v60, %v1499_v15 }
 0x3a6   :  { %v1071_v62 = vmul.f32 -1.442695, %v348_v61 }
 0x3a8   :  { %1297 = vpow2.f32 %v1071_v62 }
 0x3b2   :  { %v1298_v63 = vpop.eup %1297 }
 0x3b3   :  { %v352_v0 = vadd.f32 1.0, %v1298_v63 }
 0x3b5   :  { %1299 = vrcp.f32 %v352_v0 }
 0x3bf   :  { %v1300_v1 = vpop.eup %1299 }
 0x3c0   :  { %v368_v11 = vsub.f32 1.0, %v1300_v1  ;;  %v374_v13 = vmul.f32 %v1300_v1, %v268_v54  ;;  %v569_v54 = vadd.f32 %v488_v45, %v1499_v15 }
 0x416   :  { %v359_v2 = vpop.permute.xlu0 %358 }
 0x417   :  { %v361_v3 = vmul.f32 %v1300_v1, %v359_v2 }
 0x419   :  { %363 = vrot.lane.b32.xlu1 %v361_v3, %s1406_s1  ;;  %v595_v3 = vld [vmem:[#allocation3 + $0x4] sm:$0x1] }
 0x48b   :  { %v364_v7 = vpop.permute.xlu1 %363 }
 0x48c   :  { %v366_v8 = vadd.f32 %v364_v7, %v355_v6 }
 0x48e   :  { %1301 = vtanh.f32 %v366_v8 }
 0x498   :  { %v1302_v9 = vpop.eup %1301 }
 0x499   :  { %370 = vrot.lane.b32.xlu0 %v1302_v9, %s1405_s9 }
 0x50b   :  { %v371_v12 = vpop.permute.xlu0 %370 }
 0x50c   :  { %v373_v16 = vmul.f32 %v371_v12, %v368_v11 }
 0x50e   :  { %v375_v17 = vadd.f32 %v374_v13, %v373_v16 }
 0x510   :  { %377 = vrot.lane.b32.xlu1 %v375_v17, %s1405_s9 }
 0x582   :  { %v378_v18 = vpop.permute.xlu1 %377 }
 0x583   :  { %380 = vst.msk [vmem:[#allocation6 + $0x1] sm:$0x1] %vm34_vm1, %v378_v18  ;;  %1171 = vmatmul.mubr.msk.f32.vlgmr.msra.gmra.mrb[2].mxu1 %vm69_vm2, %v378_v18 }
 0x584   :  { %1260 = vmatpush3.bf16.msra.mxu1 %v1463_v5  ;;  %1192 = vmatprep.mubr.msk.f32.mxu1 %vm1403_vm0, %v1404_v10 }
 0x585   :  { %1261 = vmatprep.subr.bf16.mxu1 %v1402_v4 }
 0x588   :  { %1263 = vmatpush3.bf16.msra.mxu1 %v1490_v14 }
 0x589   :  { %1270 = vmatprep.subr.bf16.mxu1 %v1402_v4 }
 0x656   :  { %v450_v19 = vpop.f32.mrb[2].mxu1 }
 0x657   :  { %v463_v20 = vadd.f32 %v450_v19, %v1576_v29  ;;  %v1172_v21 = vpop.f32.mrb[3].mxu1  ;;  %v454_v23 = vadd.f32 %v450_v19, %v381_v22 }
 0x659   :  { %465 = vrot.lane.b32.xlu0 %v463_v20, %s1406_s1  ;;  %v455_v24 = vadd.f32 %v454_v23, %v1499_v15 }
 0x65b   :  { %v1073_v25 = vmul.f32 -1.442695, %v455_v24 }
 0x65d   :  { %1303 = vpow2.f32 %v1073_v25 }
 0x667   :  { %v1304_v26 = vpop.eup %1303 }
 0x668   :  { %v459_v27 = vadd.f32 1.0, %v1304_v26 }
 0x66a   :  { %1305 = vrcp.f32 %v459_v27 }
 0x674   :  { %v1306_v28 = vpop.eup %1305 }
 0x675   :  { %v475_v36 = vsub.f32 1.0, %v1306_v28  ;;  %v481_v38 = vmul.f32 %v1306_v28, %v375_v17  ;;  %v676_v17 = vadd.f32 %v595_v3, %v1499_v15 }
 0x6cb   :  { %v466_v30 = vpop.permute.xlu0 %465 }
 0x6cc   :  { %v468_v31 = vmul.f32 %v1306_v28, %v466_v30 }
 0x6ce   :  { %470 = vrot.lane.b32.xlu1 %v468_v31, %s1406_s1  ;;  %v702_v31 = vld [vmem:[#allocation3 + $0x5] sm:$0x1] }
 0x740   :  { %v471_v33 = vpop.permute.xlu1 %470 }
 0x741   :  { %v473_v34 = vadd.f32 %v471_v33, %v462_v32 }
 0x743   :  { %1307 = vtanh.f32 %v473_v34 }
 0x74d   :  { %v1308_v35 = vpop.eup %1307 }
 0x74e   :  { %477 = vrot.lane.b32.xlu0 %v1308_v35, %s1405_s9 }
 0x7c0   :  { %v478_v37 = vpop.permute.xlu0 %477 }
 0x7c1   :  { %v480_v39 = vmul.f32 %v478_v37, %v475_v36 }
 0x7c3   :  { %v482_v40 = vadd.f32 %v481_v38, %v480_v39 }
 0x7c5   :  { %484 = vrot.lane.b32.xlu1 %v482_v40, %s1405_s9 }
 0x837   :  { %v485_v41 = vpop.permute.xlu1 %484 }
 0x838   :  { %487 = vst.msk [vmem:[#allocation6 + $0x2] sm:$0x1] %vm34_vm1, %v485_v41  ;;  %1182 = vmatmul.mubr.msk.f32.vlgmr.msra.gmra.mrb[4].mxu0 %vm69_vm2, %v485_v41 }
 0x839   :  { %1266 = vmatpush3.bf16.msra.mxu0 %v1463_v5  ;;  %1203 = vmatprep.mubr.msk.f32.mxu0 %vm1403_vm0, %v1404_v10 }
 0x83a   :  { %1267 = vmatprep.subr.bf16.mxu0 %v1402_v4 }
 0x83d   :  { %1269 = vmatpush3.bf16.msra.mxu0 %v1490_v14 }
 0x83e   :  { %1276 = vmatprep.subr.bf16.mxu0 %v1402_v4 }
 0x90b   :  { %v557_v42 = vpop.f32.mrb[4].mxu0 }
 0x90c   :  { %v570_v43 = vadd.f32 %v557_v42, %v1576_v29  ;;  %v1183_v44 = vpop.f32.mrb[5].mxu0  ;;  %v561_v46 = vadd.f32 %v557_v42, %v488_v45 }
 0x90e   :  { %572 = vrot.lane.b32.xlu0 %v570_v43, %s1406_s1  ;;  %v562_v47 = vadd.f32 %v561_v46, %v1499_v15 }
 0x910   :  { %v1075_v48 = vmul.f32 -1.442695, %v562_v47 }
 0x912   :  { %1309 = vpow2.f32 %v1075_v48 }
 0x91c   :  { %v1310_v49 = vpop.eup %1309 }
 0x91d   :  { %v566_v50 = vadd.f32 1.0, %v1310_v49  ;;  %v809_v49 = vld [vmem:[#allocation3 + $0x6] sm:$0x1] }
 0x91f   :  { %1311 = vrcp.f32 %v566_v50 }
 0x929   :  { %v1312_v51 = vpop.eup %1311 }
 0x92a   :  { %v582_v58 = vsub.f32 1.0, %v1312_v51  ;;  %v588_v60 = vmul.f32 %v1312_v51, %v482_v40 }
 0x980   :  { %v573_v52 = vpop.permute.xlu0 %572 }
 0x981   :  { %v575_v53 = vmul.f32 %v1312_v51, %v573_v52 }
 0x983   :  { %577 = vrot.lane.b32.xlu1 %v575_v53, %s1406_s1 }
 0x9f5   :  { %v578_v55 = vpop.permute.xlu1 %577 }
 0x9f6   :  { %v580_v56 = vadd.f32 %v578_v55, %v569_v54 }
 0x9f8   :  { %1313 = vtanh.f32 %v580_v56 }
 0xa02   :  { %v1314_v57 = vpop.eup %1313 }
 0xa03   :  { %584 = vrot.lane.b32.xlu0 %v1314_v57, %s1405_s9 }
 0xa75   :  { %v585_v59 = vpop.permute.xlu0 %584 }
 0xa76   :  { %v587_v61 = vmul.f32 %v585_v59, %v582_v58  ;;  %v890_v58 = vadd.f32 %v809_v49, %v1499_v15 }
 0xa78   :  { %v589_v62 = vadd.f32 %v588_v60, %v587_v61 }
 0xa7a   :  { %591 = vrot.lane.b32.xlu1 %v589_v62, %s1405_s9 }
 0xaec   :  { %v592_v63 = vpop.permute.xlu1 %591 }
 0xaed   :  { %594 = vst.msk [vmem:[#allocation6 + $0x3] sm:$0x1] %vm34_vm1, %v592_v63  ;;  %1193 = vmatmul.mubr.msk.f32.vlgmr.msra.gmra.mrb[4].mxu1 %vm69_vm2, %v592_v63 }
 0xaee   :  { %1272 = vmatpush3.bf16.msra.mxu1 %v1463_v5  ;;  %1214 = vmatprep.mubr.msk.f32.mxu1 %vm1403_vm0, %v1404_v10 }
 0xaef   :  { %1273 = vmatprep.subr.bf16.mxu1 %v1402_v4 }
 0xaf2   :  { %1275 = vmatpush3.bf16.msra.mxu1 %v1490_v14 }
 0xbc0   :  { %v664_v0 = vpop.f32.mrb[4].mxu1 }
 0xbc1   :  { %v677_v1 = vadd.f32 %v664_v0, %v1576_v29  ;;  %v1194_v2 = vpop.f32.mrb[5].mxu1  ;;  %v668_v6 = vadd.f32 %v664_v0, %v595_v3 }
 0xbc3   :  { %679 = vrot.lane.b32.xlu0 %v677_v1, %s1406_s1  ;;  %v669_v7 = vadd.f32 %v668_v6, %v1499_v15 }
 0xbc5   :  { %v1077_v8 = vmul.f32 -1.442695, %v669_v7 }
 0xbc7   :  { %1315 = vpow2.f32 %v1077_v8 }
 0xbd1   :  { %v1316_v9 = vpop.eup %1315 }
 0xbd2   :  { %v673_v11 = vadd.f32 1.0, %v1316_v9  ;;  %v916_v9 = vld [vmem:[#allocation3 + $0x7] sm:$0x1] }
 0xbd4   :  { %1317 = vrcp.f32 %v673_v11 }
 0xbde   :  { %v1318_v12 = vpop.eup %1317 }
 0xbdf   :  { %v689_v21 = vsub.f32 1.0, %v1318_v12  ;;  %v695_v23 = vmul.f32 %v1318_v12, %v589_v62 }
 0xc35   :  { %v680_v13 = vpop.permute.xlu0 %679 }
 0xc36   :  { %v682_v16 = vmul.f32 %v1318_v12, %v680_v13 }
 0xc38   :  { %684 = vrot.lane.b32.xlu1 %v682_v16, %s1406_s1 }
 0xcaa   :  { %v685_v18 = vpop.permute.xlu1 %684 }
 0xcab   :  { %v687_v19 = vadd.f32 %v685_v18, %v676_v17 }
 0xcad   :  { %1319 = vtanh.f32 %v687_v19 }
 0xcb7   :  { %v1320_v20 = vpop.eup %1319 }
 0xcb8   :  { %691 = vrot.lane.b32.xlu0 %v1320_v20, %s1405_s9 }
 0xd2a   :  { %v692_v22 = vpop.permute.xlu0 %691 }
 0xd2b   :  { %v694_v24 = vmul.f32 %v692_v22, %v689_v21  ;;  %v997_v21 = vadd.f32 %v916_v9, %v1499_v15 }
 0xd2d   :  { %v696_v25 = vadd.f32 %v695_v23, %v694_v24 }
 0xd2f   :  { %698 = vrot.lane.b32.xlu1 %v696_v25, %s1405_s9 }
 0xda1   :  { %v699_v26 = vpop.permute.xlu1 %698 }
 0xda2   :  { %701 = vst.msk [vmem:[#allocation6 + $0x4] sm:$0x1] %vm34_vm1, %v699_v26  ;;  %1204 = vmatmul.mubr.msk.f32.vlgmr.msra.gmra.mrb[6].mxu0 %vm69_vm2, %v699_v26 }
 0xda3   :  { %1278 = vmatpush3.bf16.msra.mxu0 %v1463_v5  ;;  %1225 = vmatprep.mubr.msk.f32.mxu0 %vm1403_vm0, %v1404_v10 }
 0xda4   :  { %1279 = vmatprep.subr.bf16.mxu0 %v1402_v4 }
 0xda7   :  { %1281 = vmatpush3.bf16.msra.mxu0 %v1490_v14  ;;  %v783_v14 = vadd.f32 %v702_v31, %v1499_v15 }
 0xe75   :  { %v771_v27 = vpop.f32.mrb[6].mxu0 }
 0xe76   :  { %v784_v28 = vadd.f32 %v771_v27, %v1576_v29  ;;  %v1205_v30 = vpop.f32.mrb[7].mxu0  ;;  %v775_v32 = vadd.f32 %v771_v27, %v702_v31 }
 0xe78   :  { %786 = vrot.lane.b32.xlu0 %v784_v28, %s1406_s1  ;;  %v776_v33 = vadd.f32 %v775_v32, %v1499_v15 }
 0xe7a   :  { %v1079_v34 = vmul.f32 -1.442695, %v776_v33 }
 0xe7c   :  { %1321 = vpow2.f32 %v1079_v34 }
 0xe86   :  { %v1322_v5 = vpop.eup %1321 }
 0xe87   :  { %v780_v35 = vadd.f32 1.0, %v1322_v5 }
 0xe89   :  { %1323 = vrcp.f32 %v780_v35 }
 0xe93   :  { %v1324_v10 = vpop.eup %1323 }
 0xe94   :  { %v796_v40 = vsub.f32 1.0, %v1324_v10  ;;  %v802_v42 = vmul.f32 %v1324_v10, %v696_v25 }
 0xeea   :  { %v787_v36 = vpop.permute.xlu0 %786 }
 0xeeb   :  { %v789_v4 = vmul.f32 %v1324_v10, %v787_v36 }
 0xeed   :  { %791 = vrot.lane.b32.xlu1 %v789_v4, %s1406_s1 }
 0xf5f   :  { %v792_v37 = vpop.permute.xlu1 %791 }
 0xf60   :  { %v794_v38 = vadd.f32 %v792_v37, %v783_v14 }
 0xf62   :  { %1325 = vtanh.f32 %v794_v38 }
 0xf6c   :  { %v1326_v39 = vpop.eup %1325 }
 0xf6d   :  { %798 = vrot.lane.b32.xlu0 %v1326_v39, %s1405_s9 }
 0xfdf   :  { %v799_v41 = vpop.permute.xlu0 %798 }
 0xfe0   :  { %v801_v43 = vmul.f32 %v799_v41, %v796_v40 }
 0xfe2   :  { %v803_v44 = vadd.f32 %v802_v42, %v801_v43 }
 0xfe4   :  { %805 = vrot.lane.b32.xlu1 %v803_v44, %s1405_s9 }
0x1056   :  { %v806_v45 = vpop.permute.xlu1 %805 }
0x1057   :  { %808 = vst.msk [vmem:[#allocation6 + $0x5] sm:$0x1] %vm34_vm1, %v806_v45  ;;  %1215 = vmatmul.mubr.msk.f32.vlgmr.msra.gmra.mrb[6].mxu1 %vm69_vm2, %v806_v45 }
0x112a   :  { %v878_v46 = vpop.f32.mrb[6].mxu1 }
0x112b   :  { %v891_v47 = vadd.f32 %v878_v46, %v1576_v29  ;;  %v1216_v48 = vpop.f32.mrb[7].mxu1  ;;  %v882_v50 = vadd.f32 %v878_v46, %v809_v49 }
0x112d   :  { %893 = vrot.lane.b32.xlu0 %v891_v47, %s1406_s1  ;;  %v883_v51 = vadd.f32 %v882_v50, %v1499_v15 }
0x112f   :  { %v1081_v52 = vmul.f32 -1.442695, %v883_v51 }
0x1131   :  { %1327 = vpow2.f32 %v1081_v52 }
0x113b   :  { %v1328_v53 = vpop.eup %1327 }
0x113c   :  { %v887_v54 = vadd.f32 1.0, %v1328_v53 }
0x113e   :  { %1329 = vrcp.f32 %v887_v54 }
0x1148   :  { %v1330_v55 = vpop.eup %1329 }
0x1149   :  { %v903_v62 = vsub.f32 1.0, %v1330_v55  ;;  %v909_v0 = vmul.f32 %v1330_v55, %v803_v44 }
0x119f   :  { %v894_v56 = vpop.permute.xlu0 %893 }
0x11a0   :  { %v896_v57 = vmul.f32 %v1330_v55, %v894_v56 }
0x11a2   :  { %898 = vrot.lane.b32.xlu1 %v896_v57, %s1406_s1 }
0x1214   :  { %v899_v59 = vpop.permute.xlu1 %898 }
0x1215   :  { %v901_v60 = vadd.f32 %v899_v59, %v890_v58 }
0x1217   :  { %1331 = vtanh.f32 %v901_v60 }
0x1221   :  { %v1332_v61 = vpop.eup %1331 }
0x1222   :  { %905 = vrot.lane.b32.xlu0 %v1332_v61, %s1405_s9 }
0x1294   :  { %v906_v63 = vpop.permute.xlu0 %905 }
0x1295   :  { %v908_v1 = vmul.f32 %v906_v63, %v903_v62 }
0x1297   :  { %v910_v2 = vadd.f32 %v909_v0, %v908_v1 }
0x1299   :  { %912 = vrot.lane.b32.xlu1 %v910_v2, %s1405_s9 }
0x130b   :  { %v913_v3 = vpop.permute.xlu1 %912 }
0x130c   :  { %915 = vst.msk [vmem:[#allocation6 + $0x6] sm:$0x1] %vm34_vm1, %v913_v3  ;;  %1226 = vmatmul.mubr.msk.f32.vlgmr.msra.gmra.mrb[8].mxu0 %vm69_vm2, %v913_v3 }
0x13df   :  { %v985_v6 = vpop.f32.mrb[8].mxu0 }
0x13e0   :  { %v998_v7 = vadd.f32 %v985_v6, %v1576_v29  ;;  %v1227_v8 = vpop.f32.mrb[9].mxu0  ;;  %v989_v11 = vadd.f32 %v985_v6, %v916_v9 }
0x13e2   :  { %1000 = vrot.lane.b32.xlu0 %v998_v7, %s1406_s1  ;;  %v990_v12 = vadd.f32 %v989_v11, %v1499_v15 }
0x13e4   :  { %v1083_v13 = vmul.f32 -1.442695, %v990_v12 }
0x13e6   :  { %1333 = vpow2.f32 %v1083_v13 }
0x13f0   :  { %v1334_v16 = vpop.eup %1333 }
0x13f1   :  { %v994_v17 = vadd.f32 1.0, %v1334_v16 }
0x13f3   :  { %1335 = vrcp.f32 %v994_v17 }
0x13fd   :  { %v1336_v18 = vpop.eup %1335 }
0x13fe   :  { %v1010_v24 = vsub.f32 1.0, %v1336_v18  ;;  %v1016_v26 = vmul.f32 %v1336_v18, %v910_v2 }
0x1454   :  { %v1001_v19 = vpop.permute.xlu0 %1000 }
0x1455   :  { %v1003_v20 = vmul.f32 %v1336_v18, %v1001_v19 }
0x1457   :  { %1005 = vrot.lane.b32.xlu1 %v1003_v20, %s1406_s1 }
0x14c9   :  { %v1006_v29 = vpop.permute.xlu1 %1005 }
0x14ca   :  { %v1008_v22 = vadd.f32 %v1006_v29, %v997_v21 }
0x14cc   :  { %1337 = vtanh.f32 %v1008_v22 }
0x14d6   :  { %v1338_v23 = vpop.eup %1337 }
0x14d7   :  { %1012 = vrot.lane.b32.xlu0 %v1338_v23, %s1405_s9 }
0x1549   :  { %v1013_v25 = vpop.permute.xlu0 %1012 }
0x154a   :  { %v1015_v27 = vmul.f32 %v1013_v25, %v1010_v24 }
0x154c   :  { %v1017_v28 = vadd.f32 %v1016_v26, %v1015_v27 }
0x154e   :  { %1019 = vrot.lane.b32.xlu1 %v1017_v28, %s1405_s9 }
0x15c0   :  { %v1020_v30 = vpop.permute.xlu1 %1019 }
0x15c1   :  { %1022 = vst.msk [vmem:[#allocation6 + $0x7] sm:$0x1] %vm34_vm1, %v1020_v30  ;;  %1023 = vst.msk [vmem:[#allocation8] sm:$0x1] %vm34_vm1, %v1020_v30 }
0x15c2   :  { %1362 = shalt.err (!%p1359_p9)
}
0x15c3   :  { %s1363_s11 = scalar_lea.hbm %s1716_s6, 128 }
0x15c4   :  { %p1364_p10 = scmp.ne.s32.totalorder %s1716_s6, %s1363_s11  ;;  %p1367_p11 = scmp.lt.u32.totalorder %s1363_s11, %s1716_s6 }
0x15c6   :  { %p1369_p12 = pnand %p1367_p11, %p1364_p10 }
0x15c8   :  { %1372 = shalt.err (!%p1369_p12)
}
0x15c9   :  { %1033 = dma.vmem_to_hbm [thread:$0]  %s1031_s5, 128, %s1716_s6, [#allocation7]  }
0x15ca   :  { %s1373_s17 = scalar_lea.vmem %s1676_s8, 16  ;;  %s1377_s18 = scalar_lea.vmem %s1676_s8, 32 }
0x15cb   :  { %p1374_p13 = scmp.ne.s32.totalorder %s1676_s8, %s1373_s17  ;;  %p1378_p0 = scmp.lt.s32.totalorder %s1676_s8, %s1676_s8 }
0x15cc   :  { %p1379_p1 = scmp.lt.s32.totalorder %s1377_s18, %s1373_s17 }
0x15ce   :  { %p1380_p2 = por %p1379_p1, %p1378_p0 }
0x15d0   :  { %p1381_p3 = pnand %p1380_p2, %p1374_p13 }
0x15d2   :  { %1384 = shalt.err (!%p1381_p3)
}
0x15d3   :  { %s1385_s20 = scalar_lea.hbm %s1717_s7, 16 }
0x15d4   :  { %p1386_p4 = scmp.ne.s32.totalorder %s1717_s7, %s1385_s20  ;;  %p1389_p5 = scmp.lt.u32.totalorder %s1385_s20, %s1717_s7 }
0x15d6   :  { %p1391_p6 = pnand %p1389_p5, %p1386_p4 }
0x15d8   :  { %1394 = shalt.err (!%p1391_p6)
}
0x15d9   :  { %1043 = dma.vmem_to_hbm [thread:$0]  %s1676_s8, 16, %s1717_s7, [#allocation9]  }
0x15da   :  { %1397 = dma.done.wait [#allocation7], 128  }
0x15db   :  { %1398 = vsyncadd [#allocation7], 4294967168 }
0x15dc   :  { %1399 = dma.done.wait [#allocation9], 16  }
0x15dd   :  { %1400 = vsyncadd [#allocation9], 4294967280 }
0x15de   :  { %1050 = vsyncpa [#allocation7], 1 }
0x15df   :  { %1051 = vsyncpa [#allocation9], 1 }

</bundles_post_ra>
